<compile_context>
chip_gen: v5e
topology: v5e:2x2
jax: 0.10.0
libtpu: 0.0.40
codegen_flags: <defaults>
</compile_context>

<pallas_src>
import functools

import jax
import jax.numpy as jnp
from jax.experimental import pallas as pl
from jax.experimental.pallas import tpu as pltpu


def _round_up(x, m):
    return ((x + m - 1) // m) * m


def _ceil_div(a, b):
    return -(-a // b)


def _pick_time_chunk(T, max_chunk=32):
    """Largest chunk <= max_chunk that minimizes end-of-sequence padding."""
    if T <= max_chunk:
        return T
    n_chunks = _ceil_div(T, max_chunk)
    return _ceil_div(T, n_chunks)


def _pick_block_b(batch, *, max_block=128, min_batch_tiles=1):
    """Batch tile rows: multiple of 8 (sublanes), as large as possible (MXU M-fill).

    min_batch_tiles=2 guarantees at least two tiles (when batch > 8) so the
    "parallel" batch axis feeds both TensorCores on v7x.
    Returns (block_b, padded_batch)."""
    bp8 = _round_up(max(batch, 1), 8)
    bb = min(bp8, max_block)
    if min_batch_tiles > 1 and bp8 > 8:
        per_tile = _round_up(_ceil_div(bp8, min_batch_tiles), 8)
        bb = min(bb, max(per_tile, 8))
    bp = _round_up(bp8, bb)
    return bb, bp


def _default_vmem_limit_bytes():
    """Explicit scoped-VMEM limit: v5e's default is only 16 MiB, v7x has 64 MiB
    physical. Leave headroom below physical capacity."""
    try:
        cap = int(pltpu.get_tpu_info().vmem_capacity_bytes)
        return max(32 << 20, min(cap - (16 << 20), 96 << 20))
    except Exception:
        return 48 << 20  # safe on v5e / v6e / v7x


def _regu_layer_kernel(x_ref, h0_ref, wp_ref, up_ref, bp_ref,
                       out_ref, xp_ref, h_ref,
                       *, time_chunk, block_b, hp, mm_dtype):
    """One ReGU layer over one time chunk for one batch tile.

    x_ref:   (Tc, Bt, D)       input chunk
    h0_ref:  (Bt, Hp)          initial state for this batch tile
    wp_ref:  (D, 2*Hp)         packed [Wz | Wc] (zero-padded, possibly bf16)
    up_ref:  (Hp, 2*Hp)        packed [Uz | Uc] (zero-padded, possibly bf16)
    bp_ref:  (1, 2*Hp)         packed [bz | bc] (f32)
    out_ref: (Tc, Bt, Hp)      per-step hidden states
    xp_ref:  (Tc*Bt, 2*Hp) f32 VMEM scratch for the hoisted x-projection
    h_ref:   (Bt, Hp) f32      recurrent state, persists across time chunks
    """
    t = pl.program_id(1)

    @pl.when(t == 0)
    def _():
        h_ref[...] = h0_ref[...].astype(jnp.float32)

    # ---- Non-recurrent work hoisted off the serial chain -------------------
    # One (Tc*Bt, D) @ (D, 2*Hp) GEMM for the whole chunk, biases folded in.
    # Staged in VMEM scratch so the unrolled loop only keeps one slice live.
    d = x_ref.shape[-1]
    x_chunk = x_ref[...].astype(mm_dtype).reshape(time_chunk * block_b, d)
    xp_ref[...] = (jnp.dot(x_chunk, wp_ref[...].astype(mm_dtype),
                           preferred_element_type=jnp.float32)
                   + bp_ref[...].astype(jnp.float32))

    u = up_ref[...].astype(mm_dtype)                       # (Hp, 2*Hp)

    # ---- Serial recurrence over the chunk (short, static, unrolled) --------
    h = h_ref[...]                                         # (Bt, Hp) f32
    for i in range(time_chunk):
        pre = (xp_ref[i * block_b:(i + 1) * block_b, :]
               + jnp.dot(h.astype(mm_dtype), u,
                         preferred_element_type=jnp.float32))   # (Bt, 2*Hp) f32
        z = jax.nn.sigmoid(pre[:, :hp])                    # update gate   (f32)
        c = jnp.maximum(pre[:, hp:], 0.0)                  # ReLU candidate (f32)
        h = h + z * (c - h)                                # == (1-z)*h + z*c
        out_ref[i] = h.astype(out_ref.dtype)               # lane-dense (Bt, Hp) store

    h_ref[...] = h


def regu_layer(x_tbd, h0_p, packed, *, time_chunk, block_b,
               mm_dtype=jnp.bfloat16, out_dtype=None, vmem_limit_bytes=None):
    """x_tbd: (T, Bp, D) time-major, Bp % block_b == 0, T % time_chunk == 0.
    h0_p: (Bp, Hp) f32.  packed = (Wp (D, 2*Hp), Up (Hp, 2*Hp), bp (1, 2*Hp)).
    Returns (T, Bp, Hp) per-step hidden states."""
    T, Bp, D = x_tbd.shape
    wp, up, bp = packed
    Hp = wp.shape[1] // 2
    assert Bp % block_b == 0 and T % time_chunk == 0

    if out_dtype is None:
        # bf16 inter-layer activations when running the bf16 MXU path: halves the
        # (T, B, Hp) HBM writeback / next-layer read.
        out_dtype = jnp.bfloat16 if mm_dtype == jnp.bfloat16 else jnp.float32

    if wp.dtype != mm_dtype:
        # bf16 MXU operands: MXU is bf16-native on all gens; halves weight VMEM/HBM
        # residency.  Accumulation and gating stay f32.
        wp = wp.astype(mm_dtype)
        up = up.astype(mm_dtype)

    if vmem_limit_bytes is None:
        vmem_limit_bytes = _default_vmem_limit_bytes()

    kernel = functools.partial(
        _regu_layer_kernel, time_chunk=time_chunk, block_b=block_b,
        hp=Hp, mm_dtype=mm_dtype)

    def _weight_spec(shape, weight_mode):
        kwargs = {} if weight_mode is None else dict(pipeline_mode=weight_mode)
        return pl.BlockSpec(shape, lambda b, t: (0, 0), **kwargs)

    def _run(weight_mode):
        grid_spec = pltpu.PrefetchScalarGridSpec(
            num_scalar_prefetch=0,
            grid=(Bp // block_b, T // time_chunk),         # (batch tiles, time chunks)
            in_specs=[
                pl.BlockSpec((time_chunk, block_b, D), lambda b, t: (t, b, 0)),  # x
                pl.BlockSpec((block_b, Hp), lambda b, t: (b, 0)),                # h0
                _weight_spec((D, 2 * Hp), weight_mode),                          # [Wz|Wc]
                _weight_spec((Hp, 2 * Hp), weight_mode),                         # [Uz|Uc]
                _weight_spec((1, 2 * Hp), weight_mode),                          # [bz|bc]
            ],
            out_specs=pl.BlockSpec((time_chunk, block_b, Hp), lambda b, t: (t, b, 0)),
            scratch_shapes=[
                pltpu.VMEM((time_chunk * block_b, 2 * Hp), jnp.float32),  # xproj
                pltpu.VMEM((block_b, Hp), jnp.float32),                   # h state
            ],
        )
        return pl.pallas_call(
            kernel,
            out_shape=jax.ShapeDtypeStruct((T, Bp, Hp), out_dtype),
            grid_spec=grid_spec,
            compiler_params=pltpu.CompilerParams(
                # Batch tiles are independent (megacore on v7x); time carries the
                # recurrence and must stay sequential.
                dimension_semantics=("parallel", "arbitrary"),
                vmem_limit_bytes=int(vmem_limit_bytes),
            ),
        )(x_tbd, h0_p, wp, up, bp)

    try:
        # Grid-invariant weights/bias: single-buffer them (index map is constant) so
        # they are resident once instead of double-buffered.
        return _run(pl.Buffered(1))
    except Exception:
        # Fallback if this Pallas version rejects single-buffered pipeline_mode.
        return _run(None)


def _pack_regu_params(params, d_in, d_in_padded, hidden, hp):
    """Pack (Wz,Uz,bz,Wc,Uc,bc) into zero-padded [z|c] blocks of width hp each."""
    wz, uz, bz, wc, uc, bc = params
    wp = jnp.zeros((d_in_padded, 2 * hp), jnp.float32)
    wp = wp.at[:d_in, :hidden].set(wz)
    wp = wp.at[:d_in, hp:hp + hidden].set(wc)
    up = jnp.zeros((hp, 2 * hp), jnp.float32)
    up = up.at[:hidden, :hidden].set(uz)
    up = up.at[:hidden, hp:hp + hidden].set(uc)
    bp = jnp.zeros((1, 2 * hp), jnp.float32)
    bp = bp.at[0, :hidden].set(bz.reshape(hidden))
    bp = bp.at[0, hp:hp + hidden].set(bc.reshape(hidden))
    return wp, up, bp


def stacked_regu_forward(x_btd, states, layer_params, *, time_chunk=None,
                         block_b=None, mm_dtype=jnp.bfloat16,
                         min_batch_tiles=1, vmem_limit_bytes=None):
    """Mirrors StackedReGU.forward (batch-first in/out).

    x_btd: (B, T, D_in); states: list of (1, B, H); layer_params: list of
    (Wz, Uz, bz, Wc, Uc, bc).  Returns ((B, T, H) f32, [ (B, H) f32 per layer ]).
    Set min_batch_tiles=2 on v7x so both TensorCores get a batch tile."""
    B, T, D = x_btd.shape
    if block_b is None:
        block_b, Bp = _pick_block_b(B, min_batch_tiles=min_batch_tiles)
    else:
        assert block_b % 8 == 0
        Bp = _round_up(_round_up(B, 8), block_b)
    Tc = time_chunk if time_chunk is not None else _pick_time_chunk(T)
    Tp = _ceil_div(T, Tc) * Tc

    # permute(1, 0, 2) -> time-major; pad batch rows to a tile multiple and time to a
    # chunk multiple.  Padded TIME steps come after every real step, and the
    # recurrence is causal, so they never influence real outputs.  Padded BATCH rows
    # compute throwaway values (sliced off).  Padded HIDDEN columns stay exactly zero
    # (zero-padded weights, biases and initial state).
    out = jnp.transpose(x_btd, (1, 0, 2))
    out = jnp.pad(out, ((0, Tp - T), (0, Bp - B), (0, 0)))

    d_in, d_in_pad = D, D
    output_states = []
    H = None
    for params, state in zip(layer_params, states):
        H = params[1].shape[0]                      # Uz is (H, H)
        Hp = _round_up(H, 128)
        h0 = jnp.squeeze(state, axis=0)             # state.squeeze(0): (B, H)
        h0_p = jnp.zeros((Bp, Hp), jnp.float32).at[:B, :H].set(h0)
        packed = _pack_regu_params(params, d_in, d_in_pad, H, Hp)
        out = regu_layer(out, h0_p, packed, time_chunk=Tc, block_b=block_b,
                         mm_dtype=mm_dtype, vmem_limit_bytes=vmem_limit_bytes)
        # Final state of this layer == hidden at the last REAL timestep.
        output_states.append(out[T - 1, :B, :H].astype(jnp.float32))
        d_in, d_in_pad = H, Hp
    out = jnp.transpose(out[:T, :B, :H], (1, 0, 2)).astype(jnp.float32)
    return out, output_states


def init_regu_params(key, input_size, hidden_size):
    """Deterministic init, uniform(-1/sqrt(H), 1/sqrt(H)) like PyTorch RNN layers."""
    bound = 1.0 / jnp.sqrt(jnp.float32(hidden_size))
    ks = jax.random.split(key, 6)
    shapes = [(input_size, hidden_size), (hidden_size, hidden_size), (1, hidden_size),
              (input_size, hidden_size), (hidden_size, hidden_size), (1, hidden_size)]
    return tuple(jax.random.uniform(k, s, jnp.float32, -bound, bound)
                 for k, s in zip(ks, shapes))


def reference_stacked_regu(x_btd, states, layer_params):
    """Pure-JAX reference (no Pallas) for correctness check."""
    out = jnp.transpose(x_btd, (1, 0, 2))
    final_states = []
    for (wz, uz, bz, wc, uc, bc), state in zip(layer_params, states):
        h = jnp.squeeze(state, axis=0)
        ys = []
        for t in range(out.shape[0]):
            x = out[t]
            z = jax.nn.sigmoid(x @ wz + h @ uz + bz)
            c = jnp.maximum(x @ wc + h @ uc + bc, 0.0)
            h = (1.0 - z) * h + z * c
            ys.append(h)
        out = jnp.stack(ys, axis=0)
        final_states.append(h)
    return jnp.transpose(out, (1, 0, 2)), final_states


if __name__ == "__main__":
    # Small shapes consistent with the module.
    num_layers = 2
    B, T = 2, 8
    D_in, H = 16, 32            # first layer: 16 -> 32, other layers: 32 -> 32

    root = jax.random.PRNGKey(0)
    k_x, k_s, k_p = jax.random.split(root, 3)

    x = jax.random.normal(k_x, (B, T, D_in), jnp.float32)
    state_keys = jax.random.split(k_s, num_layers)
    states = [jax.random.normal(k, (1, B, H), jnp.float32) for k in state_keys]

    param_keys = jax.random.split(k_p, num_layers)
    layer_params = [init_regu_params(param_keys[0], D_in, H)]
    layer_params += [init_regu_params(param_keys[i], H, H) for i in range(1, num_layers)]

    ref_out, ref_states = reference_stacked_regu(x, states, layer_params)

    # 1) Exact-semantics path (f32 MXU operands).
    out_f32, st_f32 = stacked_regu_forward(x, states, layer_params,
                                           mm_dtype=jnp.float32)
    out_f32 = jax.block_until_ready(out_f32)
    assert out_f32.shape == (B, T, H)
    assert jnp.allclose(out_f32, ref_out, atol=1e-4, rtol=1e-4)
    for s, rs in zip(st_f32, ref_states):
        assert s.shape == (B, H)
        assert jnp.allclose(s, rs, atol=1e-4, rtol=1e-4)

    # 2) Default perf path: bf16 MXU operands + bf16 inter-layer activations
    #    (state/gating/accumulation stay f32).  Rounding compounds over T, so use a
    #    looser tolerance; validate drift at target sequence lengths before relying
    #    on bf16 for accuracy-sensitive configs.
    out_bf, st_bf = stacked_regu_forward(x, states, layer_params)
    out_bf = jax.block_until_ready(out_bf)
    assert jnp.allclose(out_bf, ref_out, atol=5e-2, rtol=5e-2)
    for s, rs in zip(st_bf, ref_states):
        assert jnp.allclose(s, rs, atol=5e-2, rtol=5e-2)

    # 3) Non-divisible T (time padding path) + two batch tiles (v7x megacore config).
    B2, T2 = 10, 35
    x2 = jax.random.normal(jax.random.PRNGKey(1), (B2, T2, D_in), jnp.float32)
    states2 = [jax.random.normal(k, (1, B2, H), jnp.float32)
               for k in jax.random.split(jax.random.PRNGKey(2), num_layers)]
    ref_out2, ref_states2 = reference_stacked_regu(x2, states2, layer_params)
    out2, st2 = stacked_regu_forward(x2, states2, layer_params,
                                     mm_dtype=jnp.float32, min_batch_tiles=2)
    out2 = jax.block_until_ready(out2)
    assert out2.shape == (B2, T2, H)
    assert jnp.allclose(out2, ref_out2, atol=1e-4, rtol=1e-4)
    for s, rs in zip(st2, ref_states2):
        assert jnp.allclose(s, rs, atol=1e-4, rtol=1e-4)

    print("KERNEL_OK")
</pallas_src>

<mosaic_0001>
module attributes {stable_mosaic.version = 11 : i64} {
  func.func @_regu_layer_kernel(%arg0: i32, %arg1: i32, %arg2: memref<8x8x16xf32, #tpu.memory_space<vmem>>, %arg3: memref<8x128xf32, #tpu.memory_space<vmem>>, %arg4: memref<16x256xf32, #tpu.memory_space<vmem>>, %arg5: memref<128x256xf32, #tpu.memory_space<vmem>>, %arg6: memref<1x256xf32, #tpu.memory_space<vmem>>, %arg7: memref<8x8x128xf32, #tpu.memory_space<vmem>>, %arg8: memref<64x256xf32, #tpu.memory_space<vmem>>, %arg9: memref<8x128xf32, #tpu.memory_space<vmem>>) attributes {dimension_semantics = [#tpu.dimension_semantics<parallel>, #tpu.dimension_semantics<arbitrary>], iteration_bounds = array<i64: 1, 1>, scalar_prefetch = 0 : i64, scratch_operands = 2 : i64, tpu.core_type = #tpu.core_type<tc>, window_params = [{transform_indices = @transform_0, window_bounds = array<i64: 8, 8, 16>}, {transform_indices = @transform_1, window_bounds = array<i64: 8, 128>}, {pipeline_mode = #tpu.pipeline_mode<synchronous>, transform_indices = @transform_2, window_bounds = array<i64: 16, 256>}, {pipeline_mode = #tpu.pipeline_mode<synchronous>, transform_indices = @transform_3, window_bounds = array<i64: 128, 256>}, {pipeline_mode = #tpu.pipeline_mode<synchronous>, transform_indices = @transform_4, window_bounds = array<i64: 1, 256>}, {transform_indices = @transform_5, window_bounds = array<i64: 8, 8, 128>}]} {
    %c0_i32 = arith.constant 0 : i32
    %0 = arith.cmpi eq, %arg1, %c0_i32 : i32
    %1 = arith.extui %0 : i1 to i32
    %c0_i32_0 = arith.constant 0 : i32
    %2 = arith.cmpi ne, %1, %c0_i32_0 : i32
    scf.if %2 {
      %c0_65 = arith.constant 0 : index
      %c0_66 = arith.constant 0 : index
      %158 = vector.load %arg3[%c0_65, %c0_66] : memref<8x128xf32, #tpu.memory_space<vmem>>, vector<8x128xf32>
      %c0_67 = arith.constant 0 : index
      %c0_68 = arith.constant 0 : index
      %159 = vector.load %arg9[%c0_67, %c0_68] : memref<8x128xf32, #tpu.memory_space<vmem>>, vector<8x128xf32>
      tpu.vector_store %arg9[%c0_67, %c0_68], %158 {strides = array<i32>} : memref<8x128xf32, #tpu.memory_space<vmem>>, vector<8x128xf32>,
    } else {
    }
    %c0 = arith.constant 0 : index
    %c0_1 = arith.constant 0 : index
    %c0_2 = arith.constant 0 : index
    %3 = vector.load %arg2[%c0, %c0_1, %c0_2] : memref<8x8x16xf32, #tpu.memory_space<vmem>>, vector<8x8x16xf32>
    %4 = vector.shape_cast %3 : vector<8x8x16xf32> to vector<64x16xf32>
    %c0_3 = arith.constant 0 : index
    %c0_4 = arith.constant 0 : index
    %5 = vector.load %arg4[%c0_3, %c0_4] : memref<16x256xf32, #tpu.memory_space<vmem>>, vector<16x256xf32>
    %cst = arith.constant dense<0.000000e+00> : vector<64x256xf32>
    %6 = tpu.matmul %4, %5, %cst {dimension_numbers = #tpu.dot_dimension_numbers<[1], [0], [0], [1], [0, 0, 1, 1], [], []>} : vector<64x16xf32>, vector<16x256xf32>, vector<64x256xf32> -> vector<64x256xf32>
    %c0_5 = arith.constant 0 : index
    %c0_6 = arith.constant 0 : index
    %7 = vector.load %arg6[%c0_5, %c0_6] : memref<1x256xf32, #tpu.memory_space<vmem>>, vector<1x256xf32>
    %8 = vector.broadcast %7 : vector<1x256xf32> to vector<64x256xf32>
    %9 = arith.addf %6, %8 : vector<64x256xf32>
    %c0_7 = arith.constant 0 : index
    %c0_8 = arith.constant 0 : index
    %10 = vector.load %arg8[%c0_7, %c0_8] : memref<64x256xf32, #tpu.memory_space<vmem>>, vector<64x256xf32>
    tpu.vector_store %arg8[%c0_7, %c0_8], %9 {strides = array<i32>} : memref<64x256xf32, #tpu.memory_space<vmem>>, vector<64x256xf32>,
    %c0_9 = arith.constant 0 : index
    %c0_10 = arith.constant 0 : index
    %11 = vector.load %arg5[%c0_9, %c0_10] : memref<128x256xf32, #tpu.memory_space<vmem>>, vector<128x256xf32>
    %c0_11 = arith.constant 0 : index
    %c0_12 = arith.constant 0 : index
    %12 = vector.load %arg9[%c0_11, %c0_12] : memref<8x128xf32, #tpu.memory_space<vmem>>, vector<8x128xf32>
    %c0_13 = arith.constant 0 : index
    %c0_14 = arith.constant 0 : index
    %13 = vector.load %arg8[%c0_13, %c0_14] : memref<64x256xf32, #tpu.memory_space<vmem>>, vector<8x256xf32>
    %cst_15 = arith.constant dense<0.000000e+00> : vector<8x256xf32>
    %14 = tpu.matmul %12, %11, %cst_15 {dimension_numbers = #tpu.dot_dimension_numbers<[1], [0], [0], [1], [0, 0, 1, 1], [], []>} : vector<8x128xf32>, vector<128x256xf32>, vector<8x256xf32> -> vector<8x256xf32>
    %15 = arith.addf %13, %14 : vector<8x256xf32>
    %16 = vector.extract_strided_slice %15 {offsets = [0, 0], sizes = [8, 128], strides = [1, 1]} : vector<8x256xf32> to vector<8x128xf32>
    %17 = arith.negf %16 : vector<8x128xf32>
    %18 = math.exp %17 : vector<8x128xf32>
    %cst_16 = arith.constant 1.000000e+00 : f32
    %19 = vector.broadcast %cst_16 : f32 to vector<8x128xf32>
    %20 = arith.addf %19, %18 : vector<8x128xf32>
    %21 = arith.divf %19, %20 : vector<8x128xf32>
    %22 = vector.extract_strided_slice %15 {offsets = [0, 128], sizes = [8, 128], strides = [1, 1]} : vector<8x256xf32> to vector<8x128xf32>
    %cst_17 = arith.constant 0.000000e+00 : f32
    %23 = vector.broadcast %cst_17 : f32 to vector<8x128xf32>
    %24 = arith.maximumf %22, %23 : vector<8x128xf32>
    %25 = arith.subf %24, %12 : vector<8x128xf32>
    %26 = arith.mulf %21, %25 : vector<8x128xf32>
    %27 = arith.addf %12, %26 : vector<8x128xf32>
    %c0_18 = arith.constant 0 : index
    %c0_19 = arith.constant 0 : index
    %c0_20 = arith.constant 0 : index
    %28 = vector.load %arg7[%c0_18, %c0_19, %c0_20] : memref<8x8x128xf32, #tpu.memory_space<vmem>>, vector<1x8x128xf32>
    %29 = vector.shape_cast %28 : vector<1x8x128xf32> to vector<8x128xf32>
    %30 = vector.shape_cast %27 : vector<8x128xf32> to vector<1x8x128xf32>
    tpu.vector_store %arg7[%c0_18, %c0_19, %c0_20], %30 {strides = array<i32>} : memref<8x8x128xf32, #tpu.memory_space<vmem>>, vector<1x8x128xf32>,
    %c8 = arith.constant 8 : index
    %c0_21 = arith.constant 0 : index
    %31 = vector.load %arg8[%c8, %c0_21] : memref<64x256xf32, #tpu.memory_space<vmem>>, vector<8x256xf32>
    %cst_22 = arith.constant dense<0.000000e+00> : vector<8x256xf32>
    %32 = tpu.matmul %27, %11, %cst_22 {dimension_numbers = #tpu.dot_dimension_numbers<[1], [0], [0], [1], [0, 0, 1, 1], [], []>} : vector<8x128xf32>, vector<128x256xf32>, vector<8x256xf32> -> vector<8x256xf32>
    %33 = arith.addf %31, %32 : vector<8x256xf32>
    %34 = vector.extract_strided_slice %33 {offsets = [0, 0], sizes = [8, 128], strides = [1, 1]} : vector<8x256xf32> to vector<8x128xf32>
    %35 = arith.negf %34 : vector<8x128xf32>
    %36 = math.exp %35 : vector<8x128xf32>
    %cst_23 = arith.constant 1.000000e+00 : f32
    %37 = vector.broadcast %cst_23 : f32 to vector<8x128xf32>
    %38 = arith.addf %37, %36 : vector<8x128xf32>
    %39 = arith.divf %37, %38 : vector<8x128xf32>
    %40 = vector.extract_strided_slice %33 {offsets = [0, 128], sizes = [8, 128], strides = [1, 1]} : vector<8x256xf32> to vector<8x128xf32>
    %cst_24 = arith.constant 0.000000e+00 : f32
    %41 = vector.broadcast %cst_24 : f32 to vector<8x128xf32>
    %42 = arith.maximumf %40, %41 : vector<8x128xf32>
    %43 = arith.subf %42, %27 : vector<8x128xf32>
    %44 = arith.mulf %39, %43 : vector<8x128xf32>
    %45 = arith.addf %27, %44 : vector<8x128xf32>
    %c1 = arith.constant 1 : index
    %c0_25 = arith.constant 0 : index
    %c0_26 = arith.constant 0 : index
    %46 = vector.load %arg7[%c1, %c0_25, %c0_26] : memref<8x8x128xf32, #tpu.memory_space<vmem>>, vector<1x8x128xf32>
    %47 = vector.shape_cast %46 : vector<1x8x128xf32> to vector<8x128xf32>
    %48 = vector.shape_cast %45 : vector<8x128xf32> to vector<1x8x128xf32>
    tpu.vector_store %arg7[%c1, %c0_25, %c0_26], %48 {strides = array<i32>} : memref<8x8x128xf32, #tpu.memory_space<vmem>>, vector<1x8x128xf32>,
    %c16 = arith.constant 16 : index
    %c0_27 = arith.constant 0 : index
    %49 = vector.load %arg8[%c16, %c0_27] : memref<64x256xf32, #tpu.memory_space<vmem>>, vector<8x256xf32>
    %cst_28 = arith.constant dense<0.000000e+00> : vector<8x256xf32>
    %50 = tpu.matmul %45, %11, %cst_28 {dimension_numbers = #tpu.dot_dimension_numbers<[1], [0], [0], [1], [0, 0, 1, 1], [], []>} : vector<8x128xf32>, vector<128x256xf32>, vector<8x256xf32> -> vector<8x256xf32>
    %51 = arith.addf %49, %50 : vector<8x256xf32>
    %52 = vector.extract_strided_slice %51 {offsets = [0, 0], sizes = [8, 128], strides = [1, 1]} : vector<8x256xf32> to vector<8x128xf32>
    %53 = arith.negf %52 : vector<8x128xf32>
    %54 = math.exp %53 : vector<8x128xf32>
    %cst_29 = arith.constant 1.000000e+00 : f32
    %55 = vector.broadcast %cst_29 : f32 to vector<8x128xf32>
    %56 = arith.addf %55, %54 : vector<8x128xf32>
    %57 = arith.divf %55, %56 : vector<8x128xf32>
    %58 = vector.extract_strided_slice %51 {offsets = [0, 128], sizes = [8, 128], strides = [1, 1]} : vector<8x256xf32> to vector<8x128xf32>
    %cst_30 = arith.constant 0.000000e+00 : f32
    %59 = vector.broadcast %cst_30 : f32 to vector<8x128xf32>
    %60 = arith.maximumf %58, %59 : vector<8x128xf32>
    %61 = arith.subf %60, %45 : vector<8x128xf32>
    %62 = arith.mulf %57, %61 : vector<8x128xf32>
    %63 = arith.addf %45, %62 : vector<8x128xf32>
    %c2 = arith.constant 2 : index
    %c0_31 = arith.constant 0 : index
    %c0_32 = arith.constant 0 : index
    %64 = vector.load %arg7[%c2, %c0_31, %c0_32] : memref<8x8x128xf32, #tpu.memory_space<vmem>>, vector<1x8x128xf32>
    %65 = vector.shape_cast %64 : vector<1x8x128xf32> to vector<8x128xf32>
    %66 = vector.shape_cast %63 : vector<8x128xf32> to vector<1x8x128xf32>
    tpu.vector_store %arg7[%c2, %c0_31, %c0_32], %66 {strides = array<i32>} : memref<8x8x128xf32, #tpu.memory_space<vmem>>, vector<1x8x128xf32>,
    %c24 = arith.constant 24 : index
    %c0_33 = arith.constant 0 : index
    %67 = vector.load %arg8[%c24, %c0_33] : memref<64x256xf32, #tpu.memory_space<vmem>>, vector<8x256xf32>
    %cst_34 = arith.constant dense<0.000000e+00> : vector<8x256xf32>
    %68 = tpu.matmul %63, %11, %cst_34 {dimension_numbers = #tpu.dot_dimension_numbers<[1], [0], [0], [1], [0, 0, 1, 1], [], []>} : vector<8x128xf32>, vector<128x256xf32>, vector<8x256xf32> -> vector<8x256xf32>
    %69 = arith.addf %67, %68 : vector<8x256xf32>
    %70 = vector.extract_strided_slice %69 {offsets = [0, 0], sizes = [8, 128], strides = [1, 1]} : vector<8x256xf32> to vector<8x128xf32>
    %71 = arith.negf %70 : vector<8x128xf32>
    %72 = math.exp %71 : vector<8x128xf32>
    %cst_35 = arith.constant 1.000000e+00 : f32
    %73 = vector.broadcast %cst_35 : f32 to vector<8x128xf32>
    %74 = arith.addf %73, %72 : vector<8x128xf32>
    %75 = arith.divf %73, %74 : vector<8x128xf32>
    %76 = vector.extract_strided_slice %69 {offsets = [0, 128], sizes = [8, 128], strides = [1, 1]} : vector<8x256xf32> to vector<8x128xf32>
    %cst_36 = arith.constant 0.000000e+00 : f32
    %77 = vector.broadcast %cst_36 : f32 to vector<8x128xf32>
    %78 = arith.maximumf %76, %77 : vector<8x128xf32>
    %79 = arith.subf %78, %63 : vector<8x128xf32>
    %80 = arith.mulf %75, %79 : vector<8x128xf32>
    %81 = arith.addf %63, %80 : vector<8x128xf32>
    %c3 = arith.constant 3 : index
    %c0_37 = arith.constant 0 : index
    %c0_38 = arith.constant 0 : index
    %82 = vector.load %arg7[%c3, %c0_37, %c0_38] : memref<8x8x128xf32, #tpu.memory_space<vmem>>, vector<1x8x128xf32>
    %83 = vector.shape_cast %82 : vector<1x8x128xf32> to vector<8x128xf32>
    %84 = vector.shape_cast %81 : vector<8x128xf32> to vector<1x8x128xf32>
    tpu.vector_store %arg7[%c3, %c0_37, %c0_38], %84 {strides = array<i32>} : memref<8x8x128xf32, #tpu.memory_space<vmem>>, vector<1x8x128xf32>,
    %c32 = arith.constant 32 : index
    %c0_39 = arith.constant 0 : index
    %85 = vector.load %arg8[%c32, %c0_39] : memref<64x256xf32, #tpu.memory_space<vmem>>, vector<8x256xf32>
    %cst_40 = arith.constant dense<0.000000e+00> : vector<8x256xf32>
    %86 = tpu.matmul %81, %11, %cst_40 {dimension_numbers = #tpu.dot_dimension_numbers<[1], [0], [0], [1], [0, 0, 1, 1], [], []>} : vector<8x128xf32>, vector<128x256xf32>, vector<8x256xf32> -> vector<8x256xf32>
    %87 = arith.addf %85, %86 : vector<8x256xf32>
    %88 = vector.extract_strided_slice %87 {offsets = [0, 0], sizes = [8, 128], strides = [1, 1]} : vector<8x256xf32> to vector<8x128xf32>
    %89 = arith.negf %88 : vector<8x128xf32>
    %90 = math.exp %89 : vector<8x128xf32>
    %cst_41 = arith.constant 1.000000e+00 : f32
    %91 = vector.broadcast %cst_41 : f32 to vector<8x128xf32>
    %92 = arith.addf %91, %90 : vector<8x128xf32>
    %93 = arith.divf %91, %92 : vector<8x128xf32>
    %94 = vector.extract_strided_slice %87 {offsets = [0, 128], sizes = [8, 128], strides = [1, 1]} : vector<8x256xf32> to vector<8x128xf32>
    %cst_42 = arith.constant 0.000000e+00 : f32
    %95 = vector.broadcast %cst_42 : f32 to vector<8x128xf32>
    %96 = arith.maximumf %94, %95 : vector<8x128xf32>
    %97 = arith.subf %96, %81 : vector<8x128xf32>
    %98 = arith.mulf %93, %97 : vector<8x128xf32>
    %99 = arith.addf %81, %98 : vector<8x128xf32>
    %c4 = arith.constant 4 : index
    %c0_43 = arith.constant 0 : index
    %c0_44 = arith.constant 0 : index
    %100 = vector.load %arg7[%c4, %c0_43, %c0_44] : memref<8x8x128xf32, #tpu.memory_space<vmem>>, vector<1x8x128xf32>
    %101 = vector.shape_cast %100 : vector<1x8x128xf32> to vector<8x128xf32>
    %102 = vector.shape_cast %99 : vector<8x128xf32> to vector<1x8x128xf32>
    tpu.vector_store %arg7[%c4, %c0_43, %c0_44], %102 {strides = array<i32>} : memref<8x8x128xf32, #tpu.memory_space<vmem>>, vector<1x8x128xf32>,
    %c40 = arith.constant 40 : index
    %c0_45 = arith.constant 0 : index
    %103 = vector.load %arg8[%c40, %c0_45] : memref<64x256xf32, #tpu.memory_space<vmem>>, vector<8x256xf32>
    %cst_46 = arith.constant dense<0.000000e+00> : vector<8x256xf32>
    %104 = tpu.matmul %99, %11, %cst_46 {dimension_numbers = #tpu.dot_dimension_numbers<[1], [0], [0], [1], [0, 0, 1, 1], [], []>} : vector<8x128xf32>, vector<128x256xf32>, vector<8x256xf32> -> vector<8x256xf32>
    %105 = arith.addf %103, %104 : vector<8x256xf32>
    %106 = vector.extract_strided_slice %105 {offsets = [0, 0], sizes = [8, 128], strides = [1, 1]} : vector<8x256xf32> to vector<8x128xf32>
    %107 = arith.negf %106 : vector<8x128xf32>
    %108 = math.exp %107 : vector<8x128xf32>
    %cst_47 = arith.constant 1.000000e+00 : f32
    %109 = vector.broadcast %cst_47 : f32 to vector<8x128xf32>
    %110 = arith.addf %109, %108 : vector<8x128xf32>
    %111 = arith.divf %109, %110 : vector<8x128xf32>
    %112 = vector.extract_strided_slice %105 {offsets = [0, 128], sizes = [8, 128], strides = [1, 1]} : vector<8x256xf32> to vector<8x128xf32>
    %cst_48 = arith.constant 0.000000e+00 : f32
    %113 = vector.broadcast %cst_48 : f32 to vector<8x128xf32>
    %114 = arith.maximumf %112, %113 : vector<8x128xf32>
    %115 = arith.subf %114, %99 : vector<8x128xf32>
    %116 = arith.mulf %111, %115 : vector<8x128xf32>
    %117 = arith.addf %99, %116 : vector<8x128xf32>
    %c5 = arith.constant 5 : index
    %c0_49 = arith.constant 0 : index
    %c0_50 = arith.constant 0 : index
    %118 = vector.load %arg7[%c5, %c0_49, %c0_50] : memref<8x8x128xf32, #tpu.memory_space<vmem>>, vector<1x8x128xf32>
    %119 = vector.shape_cast %118 : vector<1x8x128xf32> to vector<8x128xf32>
    %120 = vector.shape_cast %117 : vector<8x128xf32> to vector<1x8x128xf32>
    tpu.vector_store %arg7[%c5, %c0_49, %c0_50], %120 {strides = array<i32>} : memref<8x8x128xf32, #tpu.memory_space<vmem>>, vector<1x8x128xf32>,
    %c48 = arith.constant 48 : index
    %c0_51 = arith.constant 0 : index
    %121 = vector.load %arg8[%c48, %c0_51] : memref<64x256xf32, #tpu.memory_space<vmem>>, vector<8x256xf32>
    %cst_52 = arith.constant dense<0.000000e+00> : vector<8x256xf32>
    %122 = tpu.matmul %117, %11, %cst_52 {dimension_numbers = #tpu.dot_dimension_numbers<[1], [0], [0], [1], [0, 0, 1, 1], [], []>} : vector<8x128xf32>, vector<128x256xf32>, vector<8x256xf32> -> vector<8x256xf32>
    %123 = arith.addf %121, %122 : vector<8x256xf32>
    %124 = vector.extract_strided_slice %123 {offsets = [0, 0], sizes = [8, 128], strides = [1, 1]} : vector<8x256xf32> to vector<8x128xf32>
    %125 = arith.negf %124 : vector<8x128xf32>
    %126 = math.exp %125 : vector<8x128xf32>
    %cst_53 = arith.constant 1.000000e+00 : f32
    %127 = vector.broadcast %cst_53 : f32 to vector<8x128xf32>
    %128 = arith.addf %127, %126 : vector<8x128xf32>
    %129 = arith.divf %127, %128 : vector<8x128xf32>
    %130 = vector.extract_strided_slice %123 {offsets = [0, 128], sizes = [8, 128], strides = [1, 1]} : vector<8x256xf32> to vector<8x128xf32>
    %cst_54 = arith.constant 0.000000e+00 : f32
    %131 = vector.broadcast %cst_54 : f32 to vector<8x128xf32>
    %132 = arith.maximumf %130, %131 : vector<8x128xf32>
    %133 = arith.subf %132, %117 : vector<8x128xf32>
    %134 = arith.mulf %129, %133 : vector<8x128xf32>
    %135 = arith.addf %117, %134 : vector<8x128xf32>
    %c6 = arith.constant 6 : index
    %c0_55 = arith.constant 0 : index
    %c0_56 = arith.constant 0 : index
    %136 = vector.load %arg7[%c6, %c0_55, %c0_56] : memref<8x8x128xf32, #tpu.memory_space<vmem>>, vector<1x8x128xf32>
    %137 = vector.shape_cast %136 : vector<1x8x128xf32> to vector<8x128xf32>
    %138 = vector.shape_cast %135 : vector<8x128xf32> to vector<1x8x128xf32>
    tpu.vector_store %arg7[%c6, %c0_55, %c0_56], %138 {strides = array<i32>} : memref<8x8x128xf32, #tpu.memory_space<vmem>>, vector<1x8x128xf32>,
    %c56 = arith.constant 56 : index
    %c0_57 = arith.constant 0 : index
    %139 = vector.load %arg8[%c56, %c0_57] : memref<64x256xf32, #tpu.memory_space<vmem>>, vector<8x256xf32>
    %cst_58 = arith.constant dense<0.000000e+00> : vector<8x256xf32>
    %140 = tpu.matmul %135, %11, %cst_58 {dimension_numbers = #tpu.dot_dimension_numbers<[1], [0], [0], [1], [0, 0, 1, 1], [], []>} : vector<8x128xf32>, vector<128x256xf32>, vector<8x256xf32> -> vector<8x256xf32>
    %141 = arith.addf %139, %140 : vector<8x256xf32>
    %142 = vector.extract_strided_slice %141 {offsets = [0, 0], sizes = [8, 128], strides = [1, 1]} : vector<8x256xf32> to vector<8x128xf32>
    %143 = arith.negf %142 : vector<8x128xf32>
    %144 = math.exp %143 : vector<8x128xf32>
    %cst_59 = arith.constant 1.000000e+00 : f32
    %145 = vector.broadcast %cst_59 : f32 to vector<8x128xf32>
    %146 = arith.addf %145, %144 : vector<8x128xf32>
    %147 = arith.divf %145, %146 : vector<8x128xf32>
    %148 = vector.extract_strided_slice %141 {offsets = [0, 128], sizes = [8, 128], strides = [1, 1]} : vector<8x256xf32> to vector<8x128xf32>
    %cst_60 = arith.constant 0.000000e+00 : f32
    %149 = vector.broadcast %cst_60 : f32 to vector<8x128xf32>
    %150 = arith.maximumf %148, %149 : vector<8x128xf32>
    %151 = arith.subf %150, %135 : vector<8x128xf32>
    %152 = arith.mulf %147, %151 : vector<8x128xf32>
    %153 = arith.addf %135, %152 : vector<8x128xf32>
    %c7 = arith.constant 7 : index
    %c0_61 = arith.constant 0 : index
    %c0_62 = arith.constant 0 : index
    %154 = vector.load %arg7[%c7, %c0_61, %c0_62] : memref<8x8x128xf32, #tpu.memory_space<vmem>>, vector<1x8x128xf32>
    %155 = vector.shape_cast %154 : vector<1x8x128xf32> to vector<8x128xf32>
    %156 = vector.shape_cast %153 : vector<8x128xf32> to vector<1x8x128xf32>
    tpu.vector_store %arg7[%c7, %c0_61, %c0_62], %156 {strides = array<i32>} : memref<8x8x128xf32, #tpu.memory_space<vmem>>, vector<1x8x128xf32>,
    %c0_63 = arith.constant 0 : index
    %c0_64 = arith.constant 0 : index
    %157 = vector.load %arg9[%c0_63, %c0_64] : memref<8x128xf32, #tpu.memory_space<vmem>>, vector<8x128xf32>
    tpu.vector_store %arg9[%c0_63, %c0_64], %153 {strides = array<i32>} : memref<8x128xf32, #tpu.memory_space<vmem>>, vector<8x128xf32>,
    return
  }
  func.func @transform_0(%arg0: i32, %arg1: i32) -> (i32, i32, i32) {
    %c0_i32 = arith.constant 0 : i32
    %c0_i32_0 = arith.constant 0 : i32
    return %arg1, %arg0, %c0_i32 : i32, i32, i32
  }
  func.func @transform_1(%arg0: i32, %arg1: i32) -> (i32, i32) {
    %c0_i32 = arith.constant 0 : i32
    %c0_i32_0 = arith.constant 0 : i32
    return %arg0, %c0_i32 : i32, i32
  }
  func.func @transform_2(%arg0: i32, %arg1: i32) -> (i32, i32) {
    %c0_i32 = arith.constant 0 : i32
    %c0_i32_0 = arith.constant 0 : i32
    %c0_i32_1 = arith.constant 0 : i32
    return %c0_i32, %c0_i32_0 : i32, i32
  }
  func.func @transform_3(%arg0: i32, %arg1: i32) -> (i32, i32) {
    %c0_i32 = arith.constant 0 : i32
    %c0_i32_0 = arith.constant 0 : i32
    %c0_i32_1 = arith.constant 0 : i32
    return %c0_i32, %c0_i32_0 : i32, i32
  }
  func.func @transform_4(%arg0: i32, %arg1: i32) -> (i32, i32) {
    %c0_i32 = arith.constant 0 : i32
    %c0_i32_0 = arith.constant 0 : i32
    %c0_i32_1 = arith.constant 0 : i32
    return %c0_i32, %c0_i32_0 : i32, i32
  }
  func.func @transform_5(%arg0: i32, %arg1: i32) -> (i32, i32, i32) {
    %c0_i32 = arith.constant 0 : i32
    %c0_i32_0 = arith.constant 0 : i32
    return %arg1, %arg0, %c0_i32 : i32, i32, i32
  }
}

module attributes {stable_mosaic.version = 11 : i64} {
  func.func @_regu_layer_kernel(%arg0: i32, %arg1: i32, %arg2: memref<8x8x16xf32, #tpu.memory_space<vmem>>, %arg3: memref<8x128xf32, #tpu.memory_space<vmem>>, %arg4: memref<16x256xf32, #tpu.memory_space<vmem>>, %arg5: memref<128x256xf32, #tpu.memory_space<vmem>>, %arg6: memref<1x256xf32, #tpu.memory_space<vmem>>, %arg7: memref<8x8x128xf32, #tpu.memory_space<vmem>>, %arg8: memref<64x256xf32, #tpu.memory_space<vmem>>, %arg9: memref<8x128xf32, #tpu.memory_space<vmem>>) attributes {dimension_semantics = [#tpu.dimension_semantics<parallel>, #tpu.dimension_semantics<arbitrary>], iteration_bounds = array<i64: 1, 1>, scalar_prefetch = 0 : i64, scratch_operands = 2 : i64, tpu.core_type = #tpu.core_type<tc>, window_params = [{transform_indices = @transform_0, window_bounds = array<i64: 8, 8, 16>}, {transform_indices = @transform_1, window_bounds = array<i64: 8, 128>}, {pipeline_mode = #tpu.pipeline_mode<synchronous>, transform_indices = @transform_2, window_bounds = array<i64: 16, 256>}, {pipeline_mode = #tpu.pipeline_mode<synchronous>, transform_indices = @transform_3, window_bounds = array<i64: 128, 256>}, {pipeline_mode = #tpu.pipeline_mode<synchronous>, transform_indices = @transform_4, window_bounds = array<i64: 1, 256>}, {transform_indices = @transform_5, window_bounds = array<i64: 8, 8, 128>}]} {
    %c0_i32 = arith.constant 0 : i32
    %0 = arith.cmpi eq, %arg1, %c0_i32 : i32
    %1 = arith.extui %0 : i1 to i32
    %c0_i32_0 = arith.constant 0 : i32
    %2 = arith.cmpi ne, %1, %c0_i32_0 : i32
    scf.if %2 {
      %c0_65 = arith.constant 0 : index
      %c0_66 = arith.constant 0 : index
      %158 = vector.load %arg3[%c0_65, %c0_66] : memref<8x128xf32, #tpu.memory_space<vmem>>, vector<8x128xf32>
      %c0_67 = arith.constant 0 : index
      %c0_68 = arith.constant 0 : index
      %159 = vector.load %arg9[%c0_67, %c0_68] : memref<8x128xf32, #tpu.memory_space<vmem>>, vector<8x128xf32>
      tpu.vector_store %arg9[%c0_67, %c0_68], %158 {strides = array<i32>} : memref<8x128xf32, #tpu.memory_space<vmem>>, vector<8x128xf32>,
    } else {
    }
    %c0 = arith.constant 0 : index
    %c0_1 = arith.constant 0 : index
    %c0_2 = arith.constant 0 : index
    %3 = vector.load %arg2[%c0, %c0_1, %c0_2] : memref<8x8x16xf32, #tpu.memory_space<vmem>>, vector<8x8x16xf32>
    %4 = vector.shape_cast %3 : vector<8x8x16xf32> to vector<64x16xf32>
    %c0_3 = arith.constant 0 : index
    %c0_4 = arith.constant 0 : index
    %5 = vector.load %arg4[%c0_3, %c0_4] : memref<16x256xf32, #tpu.memory_space<vmem>>, vector<16x256xf32>
    %cst = arith.constant dense<0.000000e+00> : vector<64x256xf32>
    %6 = tpu.matmul %4, %5, %cst {dimension_numbers = #tpu.dot_dimension_numbers<[1], [0], [0], [1], [0, 0, 1, 1], [], []>} : vector<64x16xf32>, vector<16x256xf32>, vector<64x256xf32> -> vector<64x256xf32>
    %c0_5 = arith.constant 0 : index
    %c0_6 = arith.constant 0 : index
    %7 = vector.load %arg6[%c0_5, %c0_6] : memref<1x256xf32, #tpu.memory_space<vmem>>, vector<1x256xf32>
    %8 = vector.broadcast %7 : vector<1x256xf32> to vector<64x256xf32>
    %9 = arith.addf %6, %8 : vector<64x256xf32>
    %c0_7 = arith.constant 0 : index
    %c0_8 = arith.constant 0 : index
    %10 = vector.load %arg8[%c0_7, %c0_8] : memref<64x256xf32, #tpu.memory_space<vmem>>, vector<64x256xf32>
    tpu.vector_store %arg8[%c0_7, %c0_8], %9 {strides = array<i32>} : memref<64x256xf32, #tpu.memory_space<vmem>>, vector<64x256xf32>,
    %c0_9 = arith.constant 0 : index
    %c0_10 = arith.constant 0 : index
    %11 = vector.load %arg5[%c0_9, %c0_10] : memref<128x256xf32, #tpu.memory_space<vmem>>, vector<128x256xf32>
    %c0_11 = arith.constant 0 : index
    %c0_12 = arith.constant 0 : index
    %12 = vector.load %arg9[%c0_11, %c0_12] : memref<8x128xf32, #tpu.memory_space<vmem>>, vector<8x128xf32>
    %c0_13 = arith.constant 0 : index
    %c0_14 = arith.constant 0 : index
    %13 = vector.load %arg8[%c0_13, %c0_14] : memref<64x256xf32, #tpu.memory_space<vmem>>, vector<8x256xf32>
    %cst_15 = arith.constant dense<0.000000e+00> : vector<8x256xf32>
    %14 = tpu.matmul %12, %11, %cst_15 {dimension_numbers = #tpu.dot_dimension_numbers<[1], [0], [0], [1], [0, 0, 1, 1], [], []>} : vector<8x128xf32>, vector<128x256xf32>, vector<8x256xf32> -> vector<8x256xf32>
    %15 = arith.addf %13, %14 : vector<8x256xf32>
    %16 = vector.extract_strided_slice %15 {offsets = [0, 0], sizes = [8, 128], strides = [1, 1]} : vector<8x256xf32> to vector<8x128xf32>
    %17 = arith.negf %16 : vector<8x128xf32>
    %18 = math.exp %17 : vector<8x128xf32>
    %cst_16 = arith.constant 1.000000e+00 : f32
    %19 = vector.broadcast %cst_16 : f32 to vector<8x128xf32>
    %20 = arith.addf %19, %18 : vector<8x128xf32>
    %21 = arith.divf %19, %20 : vector<8x128xf32>
    %22 = vector.extract_strided_slice %15 {offsets = [0, 128], sizes = [8, 128], strides = [1, 1]} : vector<8x256xf32> to vector<8x128xf32>
    %cst_17 = arith.constant 0.000000e+00 : f32
    %23 = vector.broadcast %cst_17 : f32 to vector<8x128xf32>
    %24 = arith.maximumf %22, %23 : vector<8x128xf32>
    %25 = arith.subf %24, %12 : vector<8x128xf32>
    %26 = arith.mulf %21, %25 : vector<8x128xf32>
    %27 = arith.addf %12, %26 : vector<8x128xf32>
    %c0_18 = arith.constant 0 : index
    %c0_19 = arith.constant 0 : index
    %c0_20 = arith.constant 0 : index
    %28 = vector.load %arg7[%c0_18, %c0_19, %c0_20] : memref<8x8x128xf32, #tpu.memory_space<vmem>>, vector<1x8x128xf32>
    %29 = vector.shape_cast %28 : vector<1x8x128xf32> to vector<8x128xf32>
    %30 = vector.shape_cast %27 : vector<8x128xf32> to vector<1x8x128xf32>
    tpu.vector_store %arg7[%c0_18, %c0_19, %c0_20], %30 {strides = array<i32>} : memref<8x8x128xf32, #tpu.memory_space<vmem>>, vector<1x8x128xf32>,
    %c8 = arith.constant 8 : index
    %c0_21 = arith.constant 0 : index
    %31 = vector.load %arg8[%c8, %c0_21] : memref<64x256xf32, #tpu.memory_space<vmem>>, vector<8x256xf32>
    %cst_22 = arith.constant dense<0.000000e+00> : vector<8x256xf32>
    %32 = tpu.matmul %27, %11, %cst_22 {dimension_numbers = #tpu.dot_dimension_numbers<[1], [0], [0], [1], [0, 0, 1, 1], [], []>} : vector<8x128xf32>, vector<128x256xf32>, vector<8x256xf32> -> vector<8x256xf32>
    %33 = arith.addf %31, %32 : vector<8x256xf32>
    %34 = vector.extract_strided_slice %33 {offsets = [0, 0], sizes = [8, 128], strides = [1, 1]} : vector<8x256xf32> to vector<8x128xf32>
    %35 = arith.negf %34 : vector<8x128xf32>
    %36 = math.exp %35 : vector<8x128xf32>
    %cst_23 = arith.constant 1.000000e+00 : f32
    %37 = vector.broadcast %cst_23 : f32 to vector<8x128xf32>
    %38 = arith.addf %37, %36 : vector<8x128xf32>
    %39 = arith.divf %37, %38 : vector<8x128xf32>
    %40 = vector.extract_strided_slice %33 {offsets = [0, 128], sizes = [8, 128], strides = [1, 1]} : vector<8x256xf32> to vector<8x128xf32>
    %cst_24 = arith.constant 0.000000e+00 : f32
    %41 = vector.broadcast %cst_24 : f32 to vector<8x128xf32>
    %42 = arith.maximumf %40, %41 : vector<8x128xf32>
    %43 = arith.subf %42, %27 : vector<8x128xf32>
    %44 = arith.mulf %39, %43 : vector<8x128xf32>
    %45 = arith.addf %27, %44 : vector<8x128xf32>
    %c1 = arith.constant 1 : index
    %c0_25 = arith.constant 0 : index
    %c0_26 = arith.constant 0 : index
    %46 = vector.load %arg7[%c1, %c0_25, %c0_26] : memref<8x8x128xf32, #tpu.memory_space<vmem>>, vector<1x8x128xf32>
    %47 = vector.shape_cast %46 : vector<1x8x128xf32> to vector<8x128xf32>
    %48 = vector.shape_cast %45 : vector<8x128xf32> to vector<1x8x128xf32>
    tpu.vector_store %arg7[%c1, %c0_25, %c0_26], %48 {strides = array<i32>} : memref<8x8x128xf32, #tpu.memory_space<vmem>>, vector<1x8x128xf32>,
    %c16 = arith.constant 16 : index
    %c0_27 = arith.constant 0 : index
    %49 = vector.load %arg8[%c16, %c0_27] : memref<64x256xf32, #tpu.memory_space<vmem>>, vector<8x256xf32>
    %cst_28 = arith.constant dense<0.000000e+00> : vector<8x256xf32>
    %50 = tpu.matmul %45, %11, %cst_28 {dimension_numbers = #tpu.dot_dimension_numbers<[1], [0], [0], [1], [0, 0, 1, 1], [], []>} : vector<8x128xf32>, vector<128x256xf32>, vector<8x256xf32> -> vector<8x256xf32>
    %51 = arith.addf %49, %50 : vector<8x256xf32>
    %52 = vector.extract_strided_slice %51 {offsets = [0, 0], sizes = [8, 128], strides = [1, 1]} : vector<8x256xf32> to vector<8x128xf32>
    %53 = arith.negf %52 : vector<8x128xf32>
    %54 = math.exp %53 : vector<8x128xf32>
    %cst_29 = arith.constant 1.000000e+00 : f32
    %55 = vector.broadcast %cst_29 : f32 to vector<8x128xf32>
    %56 = arith.addf %55, %54 : vector<8x128xf32>
    %57 = arith.divf %55, %56 : vector<8x128xf32>
    %58 = vector.extract_strided_slice %51 {offsets = [0, 128], sizes = [8, 128], strides = [1, 1]} : vector<8x256xf32> to vector<8x128xf32>
    %cst_30 = arith.constant 0.000000e+00 : f32
    %59 = vector.broadcast %cst_30 : f32 to vector<8x128xf32>
    %60 = arith.maximumf %58, %59 : vector<8x128xf32>
    %61 = arith.subf %60, %45 : vector<8x128xf32>
    %62 = arith.mulf %57, %61 : vector<8x128xf32>
    %63 = arith.addf %45, %62 : vector<8x128xf32>
    %c2 = arith.constant 2 : index
    %c0_31 = arith.constant 0 : index
    %c0_32 = arith.constant 0 : index
    %64 = vector.load %arg7[%c2, %c0_31, %c0_32] : memref<8x8x128xf32, #tpu.memory_space<vmem>>, vector<1x8x128xf32>
    %65 = vector.shape_cast %64 : vector<1x8x128xf32> to vector<8x128xf32>
    %66 = vector.shape_cast %63 : vector<8x128xf32> to vector<1x8x128xf32>
    tpu.vector_store %arg7[%c2, %c0_31, %c0_32], %66 {strides = array<i32>} : memref<8x8x128xf32, #tpu.memory_space<vmem>>, vector<1x8x128xf32>,
    %c24 = arith.constant 24 : index
    %c0_33 = arith.constant 0 : index
    %67 = vector.load %arg8[%c24, %c0_33] : memref<64x256xf32, #tpu.memory_space<vmem>>, vector<8x256xf32>
    %cst_34 = arith.constant dense<0.000000e+00> : vector<8x256xf32>
    %68 = tpu.matmul %63, %11, %cst_34 {dimension_numbers = #tpu.dot_dimension_numbers<[1], [0], [0], [1], [0, 0, 1, 1], [], []>} : vector<8x128xf32>, vector<128x256xf32>, vector<8x256xf32> -> vector<8x256xf32>
    %69 = arith.addf %67, %68 : vector<8x256xf32>
    %70 = vector.extract_strided_slice %69 {offsets = [0, 0], sizes = [8, 128], strides = [1, 1]} : vector<8x256xf32> to vector<8x128xf32>
    %71 = arith.negf %70 : vector<8x128xf32>
    %72 = math.exp %71 : vector<8x128xf32>
    %cst_35 = arith.constant 1.000000e+00 : f32
    %73 = vector.broadcast %cst_35 : f32 to vector<8x128xf32>
    %74 = arith.addf %73, %72 : vector<8x128xf32>
    %75 = arith.divf %73, %74 : vector<8x128xf32>
    %76 = vector.extract_strided_slice %69 {offsets = [0, 128], sizes = [8, 128], strides = [1, 1]} : vector<8x256xf32> to vector<8x128xf32>
    %cst_36 = arith.constant 0.000000e+00 : f32
    %77 = vector.broadcast %cst_36 : f32 to vector<8x128xf32>
    %78 = arith.maximumf %76, %77 : vector<8x128xf32>
    %79 = arith.subf %78, %63 : vector<8x128xf32>
    %80 = arith.mulf %75, %79 : vector<8x128xf32>
    %81 = arith.addf %63, %80 : vector<8x128xf32>
    %c3 = arith.constant 3 : index
    %c0_37 = arith.constant 0 : index
    %c0_38 = arith.constant 0 : index
    %82 = vector.load %arg7[%c3, %c0_37, %c0_38] : memref<8x8x128xf32, #tpu.memory_space<vmem>>, vector<1x8x128xf32>
    %83 = vector.shape_cast %82 : vector<1x8x128xf32> to vector<8x128xf32>
    %84 = vector.shape_cast %81 : vector<8x128xf32> to vector<1x8x128xf32>
    tpu.vector_store %arg7[%c3, %c0_37, %c0_38], %84 {strides = array<i32>} : memref<8x8x128xf32, #tpu.memory_space<vmem>>, vector<1x8x128xf32>,
    %c32 = arith.constant 32 : index
    %c0_39 = arith.constant 0 : index
    %85 = vector.load %arg8[%c32, %c0_39] : memref<64x256xf32, #tpu.memory_space<vmem>>, vector<8x256xf32>
    %cst_40 = arith.constant dense<0.000000e+00> : vector<8x256xf32>
    %86 = tpu.matmul %81, %11, %cst_40 {dimension_numbers = #tpu.dot_dimension_numbers<[1], [0], [0], [1], [0, 0, 1, 1], [], []>} : vector<8x128xf32>, vector<128x256xf32>, vector<8x256xf32> -> vector<8x256xf32>
    %87 = arith.addf %85, %86 : vector<8x256xf32>
    %88 = vector.extract_strided_slice %87 {offsets = [0, 0], sizes = [8, 128], strides = [1, 1]} : vector<8x256xf32> to vector<8x128xf32>
    %89 = arith.negf %88 : vector<8x128xf32>
    %90 = math.exp %89 : vector<8x128xf32>
    %cst_41 = arith.constant 1.000000e+00 : f32
    %91 = vector.broadcast %cst_41 : f32 to vector<8x128xf32>
    %92 = arith.addf %91, %90 : vector<8x128xf32>
    %93 = arith.divf %91, %92 : vector<8x128xf32>
    %94 = vector.extract_strided_slice %87 {offsets = [0, 128], sizes = [8, 128], strides = [1, 1]} : vector<8x256xf32> to vector<8x128xf32>
    %cst_42 = arith.constant 0.000000e+00 : f32
    %95 = vector.broadcast %cst_42 : f32 to vector<8x128xf32>
    %96 = arith.maximumf %94, %95 : vector<8x128xf32>
    %97 = arith.subf %96, %81 : vector<8x128xf32>
    %98 = arith.mulf %93, %97 : vector<8x128xf32>
    %99 = arith.addf %81, %98 : vector<8x128xf32>
    %c4 = arith.constant 4 : index
    %c0_43 = arith.constant 0 : index
    %c0_44 = arith.constant 0 : index
    %100 = vector.load %arg7[%c4, %c0_43, %c0_44] : memref<8x8x128xf32, #tpu.memory_space<vmem>>, vector<1x8x128xf32>
    %101 = vector.shape_cast %100 : vector<1x8x128xf32> to vector<8x128xf32>
    %102 = vector.shape_cast %99 : vector<8x128xf32> to vector<1x8x128xf32>
    tpu.vector_store %arg7[%c4, %c0_43, %c0_44], %102 {strides = array<i32>} : memref<8x8x128xf32, #tpu.memory_space<vmem>>, vector<1x8x128xf32>,
    %c40 = arith.constant 40 : index
    %c0_45 = arith.constant 0 : index
    %103 = vector.load %arg8[%c40, %c0_45] : memref<64x256xf32, #tpu.memory_space<vmem>>, vector<8x256xf32>
    %cst_46 = arith.constant dense<0.000000e+00> : vector<8x256xf32>
    %104 = tpu.matmul %99, %11, %cst_46 {dimension_numbers = #tpu.dot_dimension_numbers<[1], [0], [0], [1], [0, 0, 1, 1], [], []>} : vector<8x128xf32>, vector<128x256xf32>, vector<8x256xf32> -> vector<8x256xf32>
    %105 = arith.addf %103, %104 : vector<8x256xf32>
    %106 = vector.extract_strided_slice %105 {offsets = [0, 0], sizes = [8, 128], strides = [1, 1]} : vector<8x256xf32> to vector<8x128xf32>
    %107 = arith.negf %106 : vector<8x128xf32>
    %108 = math.exp %107 : vector<8x128xf32>
    %cst_47 = arith.constant 1.000000e+00 : f32
    %109 = vector.broadcast %cst_47 : f32 to vector<8x128xf32>
    %110 = arith.addf %109, %108 : vector<8x128xf32>
    %111 = arith.divf %109, %110 : vector<8x128xf32>
    %112 = vector.extract_strided_slice %105 {offsets = [0, 128], sizes = [8, 128], strides = [1, 1]} : vector<8x256xf32> to vector<8x128xf32>
    %cst_48 = arith.constant 0.000000e+00 : f32
    %113 = vector.broadcast %cst_48 : f32 to vector<8x128xf32>
    %114 = arith.maximumf %112, %113 : vector<8x128xf32>
    %115 = arith.subf %114, %99 : vector<8x128xf32>
    %116 = arith.mulf %111, %115 : vector<8x128xf32>
    %117 = arith.addf %99, %116 : vector<8x128xf32>
    %c5 = arith.constant 5 : index
    %c0_49 = arith.constant 0 : index
    %c0_50 = arith.constant 0 : index
    %118 = vector.load %arg7[%c5, %c0_49, %c0_50] : memref<8x8x128xf32, #tpu.memory_space<vmem>>, vector<1x8x128xf32>
    %119 = vector.shape_cast %118 : vector<1x8x128xf32> to vector<8x128xf32>
    %120 = vector.shape_cast %117 : vector<8x128xf32> to vector<1x8x128xf32>
    tpu.vector_store %arg7[%c5, %c0_49, %c0_50], %120 {strides = array<i32>} : memref<8x8x128xf32, #tpu.memory_space<vmem>>, vector<1x8x128xf32>,
    %c48 = arith.constant 48 : index
    %c0_51 = arith.constant 0 : index
    %121 = vector.load %arg8[%c48, %c0_51] : memref<64x256xf32, #tpu.memory_space<vmem>>, vector<8x256xf32>
    %cst_52 = arith.constant dense<0.000000e+00> : vector<8x256xf32>
    %122 = tpu.matmul %117, %11, %cst_52 {dimension_numbers = #tpu.dot_dimension_numbers<[1], [0], [0], [1], [0, 0, 1, 1], [], []>} : vector<8x128xf32>, vector<128x256xf32>, vector<8x256xf32> -> vector<8x256xf32>
    %123 = arith.addf %121, %122 : vector<8x256xf32>
    %124 = vector.extract_strided_slice %123 {offsets = [0, 0], sizes = [8, 128], strides = [1, 1]} : vector<8x256xf32> to vector<8x128xf32>
    %125 = arith.negf %124 : vector<8x128xf32>
    %126 = math.exp %125 : vector<8x128xf32>
    %cst_53 = arith.constant 1.000000e+00 : f32
    %127 = vector.broadcast %cst_53 : f32 to vector<8x128xf32>
    %128 = arith.addf %127, %126 : vector<8x128xf32>
    %129 = arith.divf %127, %128 : vector<8x128xf32>
    %130 = vector.extract_strided_slice %123 {offsets = [0, 128], sizes = [8, 128], strides = [1, 1]} : vector<8x256xf32> to vector<8x128xf32>
    %cst_54 = arith.constant 0.000000e+00 : f32
    %131 = vector.broadcast %cst_54 : f32 to vector<8x128xf32>
    %132 = arith.maximumf %130, %131 : vector<8x128xf32>
    %133 = arith.subf %132, %117 : vector<8x128xf32>
    %134 = arith.mulf %129, %133 : vector<8x128xf32>
    %135 = arith.addf %117, %134 : vector<8x128xf32>
    %c6 = arith.constant 6 : index
    %c0_55 = arith.constant 0 : index
    %c0_56 = arith.constant 0 : index
    %136 = vector.load %arg7[%c6, %c0_55, %c0_56] : memref<8x8x128xf32, #tpu.memory_space<vmem>>, vector<1x8x128xf32>
    %137 = vector.shape_cast %136 : vector<1x8x128xf32> to vector<8x128xf32>
    %138 = vector.shape_cast %135 : vector<8x128xf32> to vector<1x8x128xf32>
    tpu.vector_store %arg7[%c6, %c0_55, %c0_56], %138 {strides = array<i32>} : memref<8x8x128xf32, #tpu.memory_space<vmem>>, vector<1x8x128xf32>,
    %c56 = arith.constant 56 : index
    %c0_57 = arith.constant 0 : index
    %139 = vector.load %arg8[%c56, %c0_57] : memref<64x256xf32, #tpu.memory_space<vmem>>, vector<8x256xf32>
    %cst_58 = arith.constant dense<0.000000e+00> : vector<8x256xf32>
    %140 = tpu.matmul %135, %11, %cst_58 {dimension_numbers = #tpu.dot_dimension_numbers<[1], [0], [0], [1], [0, 0, 1, 1], [], []>} : vector<8x128xf32>, vector<128x256xf32>, vector<8x256xf32> -> vector<8x256xf32>
    %141 = arith.addf %139, %140 : vector<8x256xf32>
    %142 = vector.extract_strided_slice %141 {offsets = [0, 0], sizes = [8, 128], strides = [1, 1]} : vector<8x256xf32> to vector<8x128xf32>
    %143 = arith.negf %142 : vector<8x128xf32>
    %144 = math.exp %143 : vector<8x128xf32>
    %cst_59 = arith.constant 1.000000e+00 : f32
    %145 = vector.broadcast %cst_59 : f32 to vector<8x128xf32>
    %146 = arith.addf %145, %144 : vector<8x128xf32>
    %147 = arith.divf %145, %146 : vector<8x128xf32>
    %148 = vector.extract_strided_slice %141 {offsets = [0, 128], sizes = [8, 128], strides = [1, 1]} : vector<8x256xf32> to vector<8x128xf32>
    %cst_60 = arith.constant 0.000000e+00 : f32
    %149 = vector.broadcast %cst_60 : f32 to vector<8x128xf32>
    %150 = arith.maximumf %148, %149 : vector<8x128xf32>
    %151 = arith.subf %150, %135 : vector<8x128xf32>
    %152 = arith.mulf %147, %151 : vector<8x128xf32>
    %153 = arith.addf %135, %152 : vector<8x128xf32>
    %c7 = arith.constant 7 : index
    %c0_61 = arith.constant 0 : index
    %c0_62 = arith.constant 0 : index
    %154 = vector.load %arg7[%c7, %c0_61, %c0_62] : memref<8x8x128xf32, #tpu.memory_space<vmem>>, vector<1x8x128xf32>
    %155 = vector.shape_cast %154 : vector<1x8x128xf32> to vector<8x128xf32>
    %156 = vector.shape_cast %153 : vector<8x128xf32> to vector<1x8x128xf32>
    tpu.vector_store %arg7[%c7, %c0_61, %c0_62], %156 {strides = array<i32>} : memref<8x8x128xf32, #tpu.memory_space<vmem>>, vector<1x8x128xf32>,
    %c0_63 = arith.constant 0 : index
    %c0_64 = arith.constant 0 : index
    %157 = vector.load %arg9[%c0_63, %c0_64] : memref<8x128xf32, #tpu.memory_space<vmem>>, vector<8x128xf32>
    tpu.vector_store %arg9[%c0_63, %c0_64], %153 {strides = array<i32>} : memref<8x128xf32, #tpu.memory_space<vmem>>, vector<8x128xf32>,
    return
  }
  func.func @transform_0(%arg0: i32, %arg1: i32) -> (i32, i32, i32) {
    %c0_i32 = arith.constant 0 : i32
    %c0_i32_0 = arith.constant 0 : i32
    return %arg1, %arg0, %c0_i32 : i32, i32, i32
  }
  func.func @transform_1(%arg0: i32, %arg1: i32) -> (i32, i32) {
    %c0_i32 = arith.constant 0 : i32
    %c0_i32_0 = arith.constant 0 : i32
    return %arg0, %c0_i32 : i32, i32
  }
  func.func @transform_2(%arg0: i32, %arg1: i32) -> (i32, i32) {
    %c0_i32 = arith.constant 0 : i32
    %c0_i32_0 = arith.constant 0 : i32
    %c0_i32_1 = arith.constant 0 : i32
    return %c0_i32, %c0_i32_0 : i32, i32
  }
  func.func @transform_3(%arg0: i32, %arg1: i32) -> (i32, i32) {
    %c0_i32 = arith.constant 0 : i32
    %c0_i32_0 = arith.constant 0 : i32
    %c0_i32_1 = arith.constant 0 : i32
    return %c0_i32, %c0_i32_0 : i32, i32
  }
  func.func @transform_4(%arg0: i32, %arg1: i32) -> (i32, i32) {
    %c0_i32 = arith.constant 0 : i32
    %c0_i32_0 = arith.constant 0 : i32
    %c0_i32_1 = arith.constant 0 : i32
    return %c0_i32, %c0_i32_0 : i32, i32
  }
  func.func @transform_5(%arg0: i32, %arg1: i32) -> (i32, i32, i32) {
    %c0_i32 = arith.constant 0 : i32
    %c0_i32_0 = arith.constant 0 : i32
    return %arg1, %arg0, %c0_i32 : i32, i32, i32
  }
}

</mosaic_0001>

<bundles_post_ra>
// kernel: tpu_custom_call.1
= control target key start
LH: loop header
LB: loop body
LE: loop exit
PB: predicated region body
PF: predicated region fallthrough
CT: control target
= control target key end

     0   :  { %10 = vsyncpa [#allocation5], 0  ;;  %s1504_s0 = inlined_call_operand.hbm [shape: f32[8,8,16], index: 0, kind: input, shape index: {}]   ;;  %s1505_s1 = inlined_call_operand.hbm [shape: f32[8,128], index: 1, kind: input, shape index: {}]   ;;  %s1506_s2 = inlined_call_operand.hbm [shape: f32[16,256], index: 2, kind: input, shape index: {}]   ;;  %s1507_s3 = inlined_call_operand.hbm [shape: f32[128,256], index: 3, kind: input, shape index: {}]   ;;  %s1508_s4 = inlined_call_operand.vmem [shape: f32[1,256], index: 4, kind: input, shape index: {}]   ;;  %s1509_s5 = inlined_call_operand.hbm [shape: f32[8,8,128], index: 5, kind: output, shape index: {}]  }
   0x1   :  { %11 = vsyncpa [#allocation8], 0 }
   0x2   :  { %12 = vsyncpa [#allocation11], 0  ;;  %s32_s20 = sshll.u32 %s1505_s1, 4  ;;  %s33_s20 = int_to_ptr.hbm [resolvable:$true] %s32_s20 }
   0x3   :  { %13 = vsyncpa [#allocation6], 0  ;;  %s1028_s21 = smov [#allocation7]   ;;  %s18_s25 = sshll.u32 %s1504_s0, 4  ;;  %s19_s25 = int_to_ptr.hbm [resolvable:$true] %s18_s25 }
   0x4   :  { %s34_s22 = sshll.u32 %s1028_s21, 4  ;;  %s1029_s26 = smov [#allocation4]   ;;  %s35_s22 = int_to_ptr.vmem [resolvable:$true] %s34_s22 }
   0x5   :  { %37 = dma.hbm_to_vmem [thread:$0]  %s33_s20, 128, %s35_s22, [#allocation8]  }
   0x6   :  { %s20_s27 = sshll.u32 %s1029_s26, 4  ;;  %s1030_s28 = smov 128   ;;  %s21_s27 = int_to_ptr.vmem [resolvable:$true] %s20_s27 }
   0x7   :  { %s1031_s29 = smov 8   ;;  %s42_s6 = sshll.u32 %s1506_s2, 4  ;;  %s43_s6 = int_to_ptr.hbm [resolvable:$true] %s42_s6 }
   0x8   :  { %26 = dma.hbm_to_vmem [thread:$0]  %s19_s25, 1024, %s21_s27, [#allocation5], %s1030_s28, %s1030_s28, %s1031_s29  }
   0x9   :  { %s1032_s7 = smov [#allocation9]   ;;  %s55_s10 = sshll.u32 %s1507_s3, 4  ;;  %s56_s10 = int_to_ptr.hbm [resolvable:$true] %s55_s10 }
   0xa   :  { %s44_s8 = sshll.u32 %s1032_s7, 4  ;;  %s1033_s11 = smov 256   ;;  %s45_s8 = int_to_ptr.vmem [resolvable:$true] %s44_s8 }
   0xb   :  { %s1034_s12 = smov 16   ;;  %s1035_s13 = smov [#allocation10]  }
   0xc   :  { %50 = dma.hbm_to_vmem [thread:$0]  %s43_s6, 512, %s45_s8, [#allocation8], %s1033_s11, %s1033_s11, %s1034_s12  }
   0xd   :  { %s57_s14 = sshll.u32 %s1035_s13, 4  ;;  %s58_s14 = int_to_ptr.vmem [resolvable:$true] %s57_s14 }
   0xe   :  { %63 = dma.hbm_to_vmem [thread:$0]  %s56_s10, 4096, %s58_s14, [#allocation11], %s1033_s11, %s1033_s11, %s1034_s12  }
   0xf   :  { %1020 = dma.done.wait [#allocation5], 1024  }
  0x10   :  { %1021 = vsyncadd [#allocation5], 4294966272 }
  0x11   :  { %1022 = dma.done.wait [#allocation8], 640  }
  0x12   :  { %1023 = vsyncadd [#allocation8], 4294966656 }
  0x13   :  { %1024 = dma.done.wait [#allocation11], 4096  }
  0x14   :  { %1025 = vsyncadd [#allocation11], 4294963200  ;;  %v1082_v0 = vld [vmem:[#allocation10 + $0xf0] sm:$0xff]  ;;  %v1084_v1 = vld [vmem:[#allocation10 + $0xe0] sm:$0xff]  ;;  %vm106_vm0 = vcmask 130048   ;;  %s820_s18 = sshll.u32 %s1509_s5, 4  ;;  %s821_s18 = int_to_ptr.hbm [resolvable:$true] %s820_s18 }
  0x15   :  { %264 = vmatpush.msra.mxu2 %v1082_v0  ;;  %v1087_v2 = vld [vmem:[#allocation10 + $0xd0] sm:$0xff]  ;;  %v1090_v3 = vld [vmem:[#allocation10 + $0xc0] sm:$0xff]  ;;  %v1092_v4 = vld [vmem:[#allocation10 + $0xf8] sm:$0xff] }
  0x16   :  { %284 = vmatpush.msra.mxu3 %v1092_v4  ;;  %v1096_v5 = vld [vmem:[#allocation10 + $0xe8] sm:$0xff]  ;;  %v1098_v6 = vld [vmem:[#allocation10 + $0xb0] sm:$0xff]  ;;  %v1100_v7 = vld [vmem:[#allocation10 + $0xd8] sm:$0xff] }
  0x17   :  { %265 = vmatpush.msra.mxu2 %v1084_v1  ;;  %v98_v8 = vld [vmem:[#allocation9 + $0x10] sm:$0xff]  ;;  %v96_v9 = vld [vmem:[#allocation9] sm:$0xff]  ;;  %v1106_v11 = vld [vmem:[#allocation10 + $0xc8] sm:$0xff] }
  0x18   :  { %285 = vmatpush.msra.mxu3 %v1096_v5  ;;  %v1104_v10 = vld [vmem:[#allocation10 + $0xa0] sm:$0xff]  ;;  %145 = vmatpush.msra.mxu0 %v98_v8  ;;  %v88_v12 = vld [vmem:[#allocation4] sm:$0xff]  ;;  %v1110_v13 = vld [vmem:[#allocation10 + $0x90] sm:$0xff] }
  0x19   :  { %266 = vmatpush.msra.mxu2 %v1087_v2  ;;  %v1112_v14 = vld [vmem:[#allocation10 + $0xb8] sm:$0xff]  ;;  %v1116_v15 = vld [vmem:[#allocation10 + $0x80] sm:$0xff]  ;;  %v1118_v16 = vld [vmem:[#allocation10 + $0xa8] sm:$0xff] }
  0x1a   :  { %286 = vmatpush.msra.mxu3 %v1100_v7  ;;  %146 = vmatpush.msra.mxu0 %v96_v9  ;;  %v99_v17 = vld [vmem:[#allocation9 + $0x18] sm:$0xff]  ;;  %v97_v18 = vld [vmem:[#allocation9 + $0x8] sm:$0xff]  ;;  %v1123_v19 = vld [vmem:[#allocation10 + $0x70] sm:$0xff] }
  0x1b   :  { %267 = vmatpush.msra.mxu2 %v1090_v3  ;;  %835 = vmatmul.msk.f32.vlgmr.msra.gmra.mxu0 %vm106_vm0, %v88_v12  ;;  %v1125_v20 = vld [vmem:[#allocation10 + $0x98] sm:$0xff]  ;;  %v1130_v21 = vld [vmem:[#allocation10 + $0x60] sm:$0xff]  ;;  %v1132_v22 = vld [vmem:[#allocation10 + $0x88] sm:$0xff] }
  0x1c   :  { %287 = vmatpush.msra.mxu3 %v1106_v11  ;;  %186 = vmatpush.msra.mxu1 %v99_v17  ;;  %v1137_v23 = vld [vmem:[#allocation10 + $0x50] sm:$0xff]  ;;  %v1139_v24 = vld [vmem:[#allocation10 + $0x78] sm:$0xff]  ;;  %v1145_v25 = vld [vmem:[#allocation10 + $0x40] sm:$0xff] }
  0x1d   :  { %268 = vmatpush.msra.mxu2 %v1098_v6  ;;  %401 = vmatpush.msrb.mxu0 %v1082_v0  ;;  %v1147_v26 = vld [vmem:[#allocation10 + $0x68] sm:$0xff]  ;;  %v1153_v27 = vld [vmem:[#allocation10 + $0x30] sm:$0xff]  ;;  %v1155_v28 = vld [vmem:[#allocation10 + $0x58] sm:$0xff] }
  0x1e   :  { %288 = vmatpush.msra.mxu3 %v1112_v14  ;;  %187 = vmatpush.msra.mxu1 %v97_v18  ;;  %v1161_v29 = vld [vmem:[#allocation10 + $0x20] sm:$0xff]  ;;  %v1163_v30 = vld [vmem:[#allocation10 + $0x48] sm:$0xff]  ;;  %v1169_v31 = vld [vmem:[#allocation10 + $0x10] sm:$0xff] }
  0x1f   :  { %269 = vmatpush.msra.mxu2 %v1104_v10  ;;  %402 = vmatpush.msrb.mxu0 %v1084_v1  ;;  %v1171_v32 = vld [vmem:[#allocation10 + $0x38] sm:$0xff]  ;;  %v1177_v33 = vld [vmem:[#allocation10] sm:$0xff]  ;;  %v1179_v34 = vld [vmem:[#allocation10 + $0x28] sm:$0xff] }
  0x20   :  { %289 = vmatpush.msra.mxu3 %v1118_v16  ;;  %843 = vmatmul.msk.f32.vlgmr.msra.gmra.mxu1 %vm106_vm0, %v88_v12  ;;  %v1184_v35 = vld [vmem:[#allocation7] sm:$0xff]  ;;  %v1194_v37 = vld [vmem:[#allocation10 + $0x8] sm:$0xff]  ;;  %v89_v45 = vld [vmem:[#allocation4 + $0x8] sm:$0xff] }
  0x21   :  { %270 = vmatpush.msra.mxu2 %v1110_v13  ;;  %403 = vmatpush.msrb.mxu0 %v1087_v2  ;;  %v1187_v36 = vld [vmem:[#allocation10 + $0x18] sm:$0xff]  ;;  %v90_v46 = vld [vmem:[#allocation4 + $0x10] sm:$0xff]  ;;  %v91_v53 = vld [vmem:[#allocation4 + $0x18] sm:$0xff] }
  0x22   :  { %290 = vmatpush.msra.mxu3 %v1125_v20  ;;  %421 = vmatpush.msrb.mxu1 %v1092_v4  ;;  %v100_v38 = vld [vmem:[%s1508_s4] sm:$0x3]  ;;  %s1036_s4 = smov [#allocation12]  }
  0x23   :  { %271 = vmatpush.msra.mxu2 %v1116_v15  ;;  %404 = vmatpush.msrb.mxu0 %v1090_v3  ;;  %v1315_v39 = vperm.slane %v100_v38, 0  ;;  %v1320_v48 = vperm.slane %v100_v38, 1  ;;  %v93_v38 = vld [vmem:[#allocation4 + $0x28] sm:$0xff]  ;;  %s818_s15 = sshll.u32 %s1036_s4, 4  ;;  %s819_s15 = int_to_ptr.vmem [resolvable:$true] %s818_s15 }
  0x24   :  { %291 = vmatpush.msra.mxu3 %v1132_v22  ;;  %422 = vmatpush.msrb.mxu1 %v1096_v5 }
  0x25   :  { %272 = vmatpush.msra.mxu2 %v1123_v19  ;;  %405 = vmatpush.msrb.mxu0 %v1098_v6 }
  0x26   :  { %292 = vmatpush.msra.mxu3 %v1139_v24  ;;  %423 = vmatpush.msrb.mxu1 %v1100_v7 }
  0x27   :  { %273 = vmatpush.msra.mxu2 %v1130_v21  ;;  %406 = vmatpush.msrb.mxu0 %v1104_v10 }
  0x28   :  { %293 = vmatpush.msra.mxu3 %v1147_v26  ;;  %424 = vmatpush.msrb.mxu1 %v1106_v11 }
  0x29   :  { %274 = vmatpush.msra.mxu2 %v1137_v23  ;;  %407 = vmatpush.msrb.mxu0 %v1110_v13 }
  0x2a   :  { %294 = vmatpush.msra.mxu3 %v1155_v28  ;;  %425 = vmatpush.msrb.mxu1 %v1112_v14 }
  0x2b   :  { %275 = vmatpush.msra.mxu2 %v1145_v25  ;;  %408 = vmatpush.msrb.mxu0 %v1116_v15 }
  0x2c   :  { %295 = vmatpush.msra.mxu3 %v1163_v30  ;;  %426 = vmatpush.msrb.mxu1 %v1118_v16 }
  0x2d   :  { %276 = vmatpush.msra.mxu2 %v1153_v27  ;;  %409 = vmatpush.msrb.mxu0 %v1123_v19 }
  0x2e   :  { %296 = vmatpush.msra.mxu3 %v1171_v32  ;;  %427 = vmatpush.msrb.mxu1 %v1125_v20 }
  0x2f   :  { %277 = vmatpush.msra.mxu2 %v1161_v29  ;;  %410 = vmatpush.msrb.mxu0 %v1130_v21 }
  0x30   :  { %297 = vmatpush.msra.mxu3 %v1179_v34  ;;  %428 = vmatpush.msrb.mxu1 %v1132_v22 }
  0x31   :  { %278 = vmatpush.msra.mxu2 %v1169_v31  ;;  %411 = vmatpush.msrb.mxu0 %v1137_v23 }
  0x32   :  { %298 = vmatpush.msra.mxu3 %v1187_v36  ;;  %429 = vmatpush.msrb.mxu1 %v1139_v24 }
  0x33   :  { %279 = vmatpush.msra.mxu2 %v1177_v33  ;;  %412 = vmatpush.msrb.mxu0 %v1145_v25 }
  0x34   :  { %280 = vmatmul.f32.vlgmr.msra.gmra.mxu2 %v1184_v35  ;;  %299 = vmatpush.msra.mxu3 %v1194_v37 }
  0x35   :  { %332 = vmatpush.msrb.mxu2 %v1082_v0  ;;  %300 = vmatmul.f32.vlgmr.msra.gmra.mxu3 %v1184_v35 }
  0x36   :  { %352 = vmatpush.msrb.mxu3 %v1092_v4  ;;  %413 = vmatpush.msrb.mxu0 %v1153_v27 }
  0x37   :  { %333 = vmatpush.msrb.mxu2 %v1084_v1  ;;  %430 = vmatpush.msrb.mxu1 %v1147_v26 }
  0x38   :  { %353 = vmatpush.msrb.mxu3 %v1096_v5  ;;  %414 = vmatpush.msrb.mxu0 %v1161_v29 }
  0x39   :  { %334 = vmatpush.msrb.mxu2 %v1087_v2  ;;  %431 = vmatpush.msrb.mxu1 %v1155_v28 }
  0x3a   :  { %354 = vmatpush.msrb.mxu3 %v1100_v7  ;;  %415 = vmatpush.msrb.mxu0 %v1169_v31 }
  0x3b   :  { %335 = vmatpush.msrb.mxu2 %v1090_v3  ;;  %432 = vmatpush.msrb.mxu1 %v1163_v30 }
  0x3c   :  { %355 = vmatpush.msrb.mxu3 %v1106_v11  ;;  %416 = vmatpush.msrb.mxu0 %v1177_v33 }
  0x3d   :  { %336 = vmatpush.msrb.mxu2 %v1098_v6  ;;  %433 = vmatpush.msrb.mxu1 %v1171_v32 }
  0x3e   :  { %356 = vmatpush.msrb.mxu3 %v1112_v14  ;;  %539 = vmatpush.msra.mxu0 %v1082_v0 }
  0x3f   :  { %337 = vmatpush.msrb.mxu2 %v1104_v10  ;;  %434 = vmatpush.msrb.mxu1 %v1179_v34 }
  0x40   :  { %357 = vmatpush.msrb.mxu3 %v1118_v16  ;;  %540 = vmatpush.msra.mxu0 %v1084_v1 }
  0x41   :  { %338 = vmatpush.msrb.mxu2 %v1110_v13  ;;  %435 = vmatpush.msrb.mxu1 %v1187_v36 }
  0x42   :  { %358 = vmatpush.msrb.mxu3 %v1125_v20  ;;  %541 = vmatpush.msra.mxu0 %v1087_v2 }
  0x43   :  { %339 = vmatpush.msrb.mxu2 %v1116_v15  ;;  %436 = vmatpush.msrb.mxu1 %v1194_v37 }
  0x44   :  { %359 = vmatpush.msrb.mxu3 %v1132_v22  ;;  %542 = vmatpush.msra.mxu0 %v1090_v3 }
  0x45   :  { %340 = vmatpush.msrb.mxu2 %v1123_v19  ;;  %559 = vmatpush.msra.mxu1 %v1092_v4 }
  0x46   :  { %360 = vmatpush.msrb.mxu3 %v1139_v24  ;;  %543 = vmatpush.msra.mxu0 %v1098_v6 }
  0x47   :  { %341 = vmatpush.msrb.mxu2 %v1130_v21  ;;  %560 = vmatpush.msra.mxu1 %v1096_v5 }
  0x48   :  { %361 = vmatpush.msrb.mxu3 %v1147_v26  ;;  %544 = vmatpush.msra.mxu0 %v1104_v10 }
  0x49   :  { %342 = vmatpush.msrb.mxu2 %v1137_v23  ;;  %561 = vmatpush.msra.mxu1 %v1100_v7 }
  0x4a   :  { %362 = vmatpush.msrb.mxu3 %v1155_v28  ;;  %545 = vmatpush.msra.mxu0 %v1110_v13 }
  0x4b   :  { %343 = vmatpush.msrb.mxu2 %v1145_v25  ;;  %562 = vmatpush.msra.mxu1 %v1106_v11 }
  0x4c   :  { %363 = vmatpush.msrb.mxu3 %v1163_v30  ;;  %546 = vmatpush.msra.mxu0 %v1116_v15 }
  0x4d   :  { %344 = vmatpush.msrb.mxu2 %v1153_v27  ;;  %563 = vmatpush.msra.mxu1 %v1112_v14 }
  0x4e   :  { %364 = vmatpush.msrb.mxu3 %v1171_v32  ;;  %547 = vmatpush.msra.mxu0 %v1123_v19 }
  0x4f   :  { %345 = vmatpush.msrb.mxu2 %v1161_v29  ;;  %564 = vmatpush.msra.mxu1 %v1118_v16 }
  0x50   :  { %365 = vmatpush.msrb.mxu3 %v1179_v34  ;;  %548 = vmatpush.msra.mxu0 %v1130_v21 }
  0x51   :  { %346 = vmatpush.msrb.mxu2 %v1169_v31  ;;  %565 = vmatpush.msra.mxu1 %v1125_v20 }
  0x52   :  { %366 = vmatpush.msrb.mxu3 %v1187_v36  ;;  %549 = vmatpush.msra.mxu0 %v1137_v23 }
  0x53   :  { %347 = vmatpush.msrb.mxu2 %v1177_v33  ;;  %566 = vmatpush.msra.mxu1 %v1132_v22 }
  0x54   :  { %367 = vmatpush.msrb.mxu3 %v1194_v37  ;;  %550 = vmatpush.msra.mxu0 %v1145_v25 }
  0x55   :  { %470 = vmatpush.msra.mxu2 %v1082_v0  ;;  %567 = vmatpush.msra.mxu1 %v1139_v24 }
  0x56   :  { %490 = vmatpush.msra.mxu3 %v1092_v4  ;;  %551 = vmatpush.msra.mxu0 %v1153_v27 }
  0x57   :  { %471 = vmatpush.msra.mxu2 %v1084_v1  ;;  %568 = vmatpush.msra.mxu1 %v1147_v26 }
  0x58   :  { %491 = vmatpush.msra.mxu3 %v1096_v5  ;;  %552 = vmatpush.msra.mxu0 %v1161_v29 }
  0x59   :  { %472 = vmatpush.msra.mxu2 %v1087_v2  ;;  %569 = vmatpush.msra.mxu1 %v1155_v28 }
  0x5a   :  { %492 = vmatpush.msra.mxu3 %v1100_v7  ;;  %553 = vmatpush.msra.mxu0 %v1169_v31 }
  0x5b   :  { %473 = vmatpush.msra.mxu2 %v1090_v3  ;;  %570 = vmatpush.msra.mxu1 %v1163_v30 }
  0x5c   :  { %493 = vmatpush.msra.mxu3 %v1106_v11  ;;  %554 = vmatpush.msra.mxu0 %v1177_v33 }
  0x5d   :  { %474 = vmatpush.msra.mxu2 %v1098_v6  ;;  %571 = vmatpush.msra.mxu1 %v1171_v32 }
  0x5e   :  { %494 = vmatpush.msra.mxu3 %v1112_v14  ;;  %836 = vmatmul.msk.f32.gmra.mxu0 %vm106_vm0, %v89_v45 }
  0x5f   :  { %475 = vmatpush.msra.mxu2 %v1104_v10  ;;  %572 = vmatpush.msra.mxu1 %v1179_v34 }
  0x60   :  { %495 = vmatpush.msra.mxu3 %v1118_v16  ;;  %844 = vmatmul.msk.f32.gmra.mxu1 %vm106_vm0, %v89_v45 }
  0x61   :  { %476 = vmatpush.msra.mxu2 %v1110_v13  ;;  %573 = vmatpush.msra.mxu1 %v1187_v36 }
  0x62   :  { %496 = vmatpush.msra.mxu3 %v1125_v20 }
  0x63   :  { %477 = vmatpush.msra.mxu2 %v1116_v15  ;;  %574 = vmatpush.msra.mxu1 %v1194_v37 }
  0x64   :  { %497 = vmatpush.msra.mxu3 %v1132_v22 }
  0x65   :  { %478 = vmatpush.msra.mxu2 %v1123_v19 }
  0x66   :  { %498 = vmatpush.msra.mxu3 %v1139_v24  ;;  %837 = vmatmul.msk.f32.gmra.mxu0 %vm106_vm0, %v90_v46 }
  0x67   :  { %479 = vmatpush.msra.mxu2 %v1130_v21 }
  0x68   :  { %499 = vmatpush.msra.mxu3 %v1147_v26  ;;  %845 = vmatmul.msk.f32.gmra.mxu1 %vm106_vm0, %v90_v46 }
  0x69   :  { %480 = vmatpush.msra.mxu2 %v1137_v23 }
  0x6a   :  { %500 = vmatpush.msra.mxu3 %v1155_v28 }
  0x6b   :  { %481 = vmatpush.msra.mxu2 %v1145_v25 }
  0x6c   :  { %501 = vmatpush.msra.mxu3 %v1163_v30 }
  0x6d   :  { %482 = vmatpush.msra.mxu2 %v1153_v27 }
  0x6e   :  { %502 = vmatpush.msra.mxu3 %v1171_v32  ;;  %838 = vmatmul.msk.f32.gmra.mxu0 %vm106_vm0, %v91_v53 }
  0x6f   :  { %483 = vmatpush.msra.mxu2 %v1161_v29 }
  0x70   :  { %503 = vmatpush.msra.mxu3 %v1179_v34  ;;  %846 = vmatmul.msk.f32.gmra.mxu1 %vm106_vm0, %v91_v53 }
  0x71   :  { %484 = vmatpush.msra.mxu2 %v1169_v31 }
  0x72   :  { %504 = vmatpush.msra.mxu3 %v1187_v36 }
  0x73   :  { %485 = vmatpush.msra.mxu2 %v1177_v33 }
  0x74   :  { %505 = vmatpush.msra.mxu3 %v1194_v37 }
  0x98   :  { %v148_v40 = vpop.f32.mrf.mxu0 }
  0x99   :  { %v149_v41 = vadd.f32 %v148_v40, %v1315_v39  ;;  %v94_v40 = vld [vmem:[#allocation4 + $0x30] sm:$0xff] }
  0x9d   :  { %v189_v50 = vpop.f32.mrf.mxu1 }
  0x9e   :  { %v190_v51 = vadd.f32 %v189_v50, %v1320_v48 }
  0xb7   :  { %v281_v42 = vpop.f32.mrf.mxu2 }
  0xb8   :  { %v304_v43 = vadd.f32 %v281_v42, %v149_v41  ;;  %v301_v52 = vpop.f32.mrf.mxu3  ;;  %v95_v42 = vld [vmem:[#allocation4 + $0x38] sm:$0xff] }
  0xb9   :  { %v305_v54 = vadd.f32 %v301_v52, %v190_v51 }
  0xba   :  { %v851_v44 = vmul.f32 -1.442695, %v304_v43 }
  0xbb   :  { %v325_v58 = vmax.f32 %v305_v54, 0.0 }
  0xbc   :  { %868 = vpow2.f32 %v851_v44 }
  0xbd   :  { %v326_v63 = vsub.f32 %v325_v58, %v1184_v35 }
  0xc2   :  { %v869_v47 = vpop.eup %868 }
  0xc3   :  { %v309_v49 = vadd.f32 1.0, %v869_v47 }
  0xc5   :  { %870 = vrcp.f32 %v309_v49  ;;  %v321_v59 = vand.u32 2147483648, %v309_v49  ;;  %v319_v61 = vand.u32 2147483647, %v309_v49  ;;  %vm315_vm2 = vweird.f32 %v309_v49 }
  0xc7   :  { %v322_v8 = vor.u32 1.1754944e-38, %v321_v59  ;;  %vm320_vm4 = vcmp.eq.f32.partialorder %v319_v61, 8.507059e+37 }
  0xcb   :  { %v871_v55 = vpop.eup %870 }
  0xcc   :  { %v311_v56 = vmul.f32 %v871_v55, %v309_v49  ;;  %vm316_vm1 = vweird.f32 %v871_v55 }
  0xcd   :  { %vm317_vm3 = vmor %vm315_vm2, %vm316_vm1 }
  0xce   :  { %v312_v57 = vsub.f32 1.0, %v311_v56 }
  0xd0   :  { %v313_v60 = vmul.f32 %v871_v55, %v312_v57 }
  0xd2   :  { %v314_v62 = vadd.f32 %v871_v55, %v313_v60 }
  0xd4   :  { %v318_v9 = vsel %vm317_vm3, %v871_v55, %v314_v62 }
  0xd5   :  { %v323_v12 = vsel %vm320_vm4, %v322_v8, %v318_v9 }
  0xd6   :  { %v327_v17 = vmul.f32 %v326_v63, %v323_v12 }
  0xd8   :  { %v1329_v18 = vadd.f32 %v327_v17, %v1184_v35  ;;  %v92_v35 = vld [vmem:[#allocation4 + $0x20] sm:$0xff] }
  0xd9   :  { %839 = vmatmul.msk.f32.gmra.mxu0 %vm106_vm0, %v92_v35  ;;  %847 = vmatmul.msk.f32.gmra.mxu1 %vm106_vm0, %v92_v35 }
  0xda   :  { %329 = vst [vmem:[#allocation12] sm:$0xff] %v1329_v18  ;;  %348 = vmatmul.f32.vlgmr.msrb.gmra.mxu2 %v1329_v18  ;;  %368 = vmatmul.f32.vlgmr.msrb.gmra.mxu3 %v1329_v18 }
  0xdb   :  { %608 = vmatpush.msrb.mxu2 %v1082_v0  ;;  %628 = vmatpush.msrb.mxu3 %v1092_v4  ;;  %v151_v41 = vpop.f32.mrf.mxu0 }
  0xdc   :  { %v152_v43 = vadd.f32 %v151_v41, %v1315_v39 }
  0xdd   :  { %609 = vmatpush.msrb.mxu2 %v1084_v1  ;;  %629 = vmatpush.msrb.mxu3 %v1096_v5  ;;  %v192_v50 = vpop.f32.mrf.mxu1 }
  0xde   :  { %v193_v51 = vadd.f32 %v192_v50, %v1320_v48 }
  0xdf   :  { %610 = vmatpush.msrb.mxu2 %v1087_v2  ;;  %630 = vmatpush.msrb.mxu3 %v1100_v7 }
  0xe1   :  { %611 = vmatpush.msrb.mxu2 %v1090_v3  ;;  %631 = vmatpush.msrb.mxu3 %v1106_v11 }
  0xe2   :  { %840 = vmatmul.msk.f32.gmra.mxu0 %vm106_vm0, %v93_v38  ;;  %848 = vmatmul.msk.f32.gmra.mxu1 %vm106_vm0, %v93_v38 }
  0xe3   :  { %612 = vmatpush.msrb.mxu2 %v1098_v6  ;;  %632 = vmatpush.msrb.mxu3 %v1112_v14 }
  0xe5   :  { %613 = vmatpush.msrb.mxu2 %v1104_v10  ;;  %633 = vmatpush.msrb.mxu3 %v1118_v16  ;;  %v195_v38 = vpop.f32.mrf.mxu1 }
  0xe7   :  { %614 = vmatpush.msrb.mxu2 %v1110_v13  ;;  %634 = vmatpush.msrb.mxu3 %v1125_v20 }
  0xe9   :  { %615 = vmatpush.msrb.mxu2 %v1116_v15  ;;  %635 = vmatpush.msrb.mxu3 %v1132_v22 }
  0xea   :  { %841 = vmatmul.msk.f32.gmra.mxu0 %vm106_vm0, %v94_v40  ;;  %849 = vmatmul.msk.f32.gmra.mxu1 %vm106_vm0, %v94_v40 }
  0xeb   :  { %616 = vmatpush.msrb.mxu2 %v1123_v19  ;;  %636 = vmatpush.msrb.mxu3 %v1139_v24 }
  0xed   :  { %617 = vmatpush.msrb.mxu2 %v1130_v21  ;;  %637 = vmatpush.msrb.mxu3 %v1147_v26  ;;  %v1419_v41 = vpop.f32.mrf.mxu1 }
  0xef   :  { %618 = vmatpush.msrb.mxu2 %v1137_v23  ;;  %638 = vmatpush.msrb.mxu3 %v1155_v28 }
  0xf1   :  { %619 = vmatpush.msrb.mxu2 %v1145_v25  ;;  %639 = vmatpush.msrb.mxu3 %v1163_v30 }
  0xf2   :  { %842 = vmatmul.msk.f32.gmra.mxu0 %vm106_vm0, %v95_v42  ;;  %850 = vmatmul.msk.f32.gmra.mxu1 %vm106_vm0, %v95_v42 }
  0xf3   :  { %620 = vmatpush.msrb.mxu2 %v1153_v27  ;;  %640 = vmatpush.msrb.mxu3 %v1171_v32 }
  0xf5   :  { %621 = vmatpush.msrb.mxu2 %v1161_v29  ;;  %641 = vmatpush.msrb.mxu3 %v1179_v34 }
  0xf7   :  { %622 = vmatpush.msrb.mxu2 %v1169_v31  ;;  %642 = vmatpush.msrb.mxu3 %v1187_v36 }
  0xf9   :  { %623 = vmatpush.msrb.mxu2 %v1177_v33  ;;  %643 = vmatpush.msrb.mxu3 %v1194_v37 }
 0x15d   :  { %v349_v44 = vpop.f32.mrf.mxu2  ;;  %v369_v52 = vpop.f32.mrf.mxu3 }
 0x15e   :  { %v372_v45 = vadd.f32 %v349_v44, %v152_v43  ;;  %v373_v55 = vadd.f32 %v369_v52, %v193_v51  ;;  %v1423_v43 = vpop.f32.mrf.mxu1 }
 0x160   :  { %v852_v46 = vmul.f32 -1.442695, %v372_v45  ;;  %v393_v60 = vmax.f32 %v373_v55, 0.0 }
 0x162   :  { %872 = vpow2.f32 %v852_v46  ;;  %v394_v8 = vsub.f32 %v393_v60, %v1329_v18 }
 0x166   :  { %v1427_v45 = vpop.f32.mrf.mxu1 }
 0x168   :  { %v873_v47 = vpop.eup %872 }
 0x169   :  { %v377_v49 = vadd.f32 1.0, %v873_v47 }
 0x16b   :  { %874 = vrcp.f32 %v377_v49  ;;  %v389_v57 = vand.u32 2147483648, %v377_v49  ;;  %v387_v59 = vand.u32 2147483647, %v377_v49  ;;  %vm383_vm6 = vweird.f32 %v377_v49 }
 0x16d   :  { %v390_v62 = vor.u32 1.1754944e-38, %v389_v57  ;;  %vm388_vm8 = vcmp.eq.f32.partialorder %v387_v59, 8.507059e+37  ;;  %v196_v57 = vadd.f32 %v195_v38, %v1320_v48 }
 0x16e   :  { %v1431_v47 = vpop.f32.mrf.mxu1 }
 0x171   :  { %v875_v53 = vpop.eup %874 }
 0x172   :  { %v379_v54 = vmul.f32 %v875_v53, %v377_v49  ;;  %vm384_vm5 = vweird.f32 %v875_v53 }
 0x173   :  { %vm385_vm7 = vmor %vm383_vm6, %vm384_vm5 }
 0x174   :  { %v380_v56 = vsub.f32 1.0, %v379_v54 }
 0x176   :  { %v381_v58 = vmul.f32 %v875_v53, %v380_v56 }
 0x178   :  { %v382_v61 = vadd.f32 %v875_v53, %v381_v58 }
 0x17a   :  { %v386_v63 = vsel %vm385_vm7, %v875_v53, %v382_v61  ;;  %v1434_v53 = vpop.f32.mrf.mxu1 }
 0x17b   :  { %v391_v9 = vsel %vm388_vm8, %v390_v62, %v386_v63 }
 0x17c   :  { %v395_v12 = vmul.f32 %v394_v8, %v391_v9 }
 0x17e   :  { %v1378_v17 = vadd.f32 %v395_v12, %v1329_v18  ;;  %v154_v18 = vpop.f32.mrf.mxu0 }
 0x17f   :  { %v155_v49 = vadd.f32 %v154_v18, %v1315_v39 }
 0x180   :  { %398 = vst [vmem:[#allocation12 + $0x8] sm:$0xff] %v1378_v17  ;;  %417 = vmatmul.f32.vlgmr.msrb.gmra.mxu0 %v1378_v17  ;;  %437 = vmatmul.f32.vlgmr.msrb.gmra.mxu1 %v1378_v17 }
 0x181   :  { %677 = vmatpush.msrb.mxu0 %v1082_v0  ;;  %697 = vmatpush.msrb.mxu1 %v1092_v4 }
 0x183   :  { %678 = vmatpush.msrb.mxu0 %v1084_v1  ;;  %698 = vmatpush.msrb.mxu1 %v1096_v5 }
 0x185   :  { %679 = vmatpush.msrb.mxu0 %v1087_v2  ;;  %699 = vmatpush.msrb.mxu1 %v1100_v7 }
 0x186   :  { %v1415_v35 = vpop.f32.mrf.mxu0 }
 0x187   :  { %680 = vmatpush.msrb.mxu0 %v1090_v3  ;;  %700 = vmatpush.msrb.mxu1 %v1106_v11 }
 0x189   :  { %681 = vmatpush.msrb.mxu0 %v1098_v6  ;;  %701 = vmatpush.msrb.mxu1 %v1112_v14 }
 0x18b   :  { %682 = vmatpush.msrb.mxu0 %v1104_v10  ;;  %702 = vmatpush.msrb.mxu1 %v1118_v16 }
 0x18d   :  { %683 = vmatpush.msrb.mxu0 %v1110_v13  ;;  %703 = vmatpush.msrb.mxu1 %v1125_v20 }
 0x18e   :  { %v1417_v40 = vpop.f32.mrf.mxu0 }
 0x18f   :  { %684 = vmatpush.msrb.mxu0 %v1116_v15  ;;  %704 = vmatpush.msrb.mxu1 %v1132_v22 }
 0x191   :  { %685 = vmatpush.msrb.mxu0 %v1123_v19  ;;  %705 = vmatpush.msrb.mxu1 %v1139_v24 }
 0x193   :  { %686 = vmatpush.msrb.mxu0 %v1130_v21  ;;  %706 = vmatpush.msrb.mxu1 %v1147_v26 }
 0x195   :  { %687 = vmatpush.msrb.mxu0 %v1137_v23  ;;  %707 = vmatpush.msrb.mxu1 %v1155_v28 }
 0x196   :  { %v1421_v42 = vpop.f32.mrf.mxu0 }
 0x197   :  { %688 = vmatpush.msrb.mxu0 %v1145_v25  ;;  %708 = vmatpush.msrb.mxu1 %v1163_v30 }
 0x199   :  { %689 = vmatpush.msrb.mxu0 %v1153_v27  ;;  %709 = vmatpush.msrb.mxu1 %v1171_v32 }
 0x19b   :  { %690 = vmatpush.msrb.mxu0 %v1161_v29  ;;  %710 = vmatpush.msrb.mxu1 %v1179_v34 }
 0x19d   :  { %691 = vmatpush.msrb.mxu0 %v1169_v31  ;;  %711 = vmatpush.msrb.mxu1 %v1187_v36 }
 0x19e   :  { %v1425_v44 = vpop.f32.mrf.mxu0 }
 0x19f   :  { %692 = vmatpush.msrb.mxu0 %v1177_v33  ;;  %712 = vmatpush.msrb.mxu1 %v1194_v37 }
 0x1a6   :  { %v1429_v46 = vpop.f32.mrf.mxu0 }
 0x1fd   :  { %v418_v50 = vpop.f32.mrf.mxu0  ;;  %v438_v56 = vpop.f32.mrf.mxu1 }
 0x1fe   :  { %v441_v51 = vadd.f32 %v418_v50, %v155_v49  ;;  %v442_v60 = vadd.f32 %v438_v56, %v196_v57 }
 0x200   :  { %v853_v52 = vmul.f32 -1.442695, %v441_v51  ;;  %v462_v9 = vmax.f32 %v442_v60, 0.0 }
 0x202   :  { %876 = vpow2.f32 %v853_v52  ;;  %v463_v50 = vsub.f32 %v462_v9, %v1378_v17 }
 0x208   :  { %v877_v54 = vpop.eup %876 }
 0x209   :  { %v446_v55 = vadd.f32 1.0, %v877_v54 }
 0x20b   :  { %878 = vrcp.f32 %v446_v55  ;;  %v458_v62 = vand.u32 2147483648, %v446_v55  ;;  %v456_v8 = vand.u32 2147483647, %v446_v55  ;;  %vm452_vm10 = vweird.f32 %v446_v55 }
 0x20d   :  { %v459_v18 = vor.u32 1.1754944e-38, %v458_v62  ;;  %vm457_vm12 = vcmp.eq.f32.partialorder %v456_v8, 8.507059e+37 }
 0x211   :  { %v879_v58 = vpop.eup %878 }
 0x212   :  { %v448_v59 = vmul.f32 %v879_v58, %v446_v55  ;;  %vm453_vm9 = vweird.f32 %v879_v58 }
 0x213   :  { %vm454_vm11 = vmor %vm452_vm10, %vm453_vm9 }
 0x214   :  { %v449_v61 = vsub.f32 1.0, %v448_v59 }
 0x216   :  { %v450_v63 = vmul.f32 %v879_v58, %v449_v61 }
 0x218   :  { %v451_v12 = vadd.f32 %v879_v58, %v450_v63 }
 0x21a   :  { %v455_v49 = vsel %vm454_vm11, %v879_v58, %v451_v12 }
 0x21b   :  { %v460_v51 = vsel %vm457_vm12, %v459_v18, %v455_v49 }
 0x21c   :  { %v464_v52 = vmul.f32 %v463_v50, %v460_v51  ;;  %v205_v51 = vadd.f32 %v1427_v45, %v1320_v48  ;;  %v167_v45 = vadd.f32 %v1425_v44, %v1315_v39 }
 0x21e   :  { %v1439_v38 = vadd.f32 %v464_v52, %v1378_v17 }
 0x220   :  { %467 = vst [vmem:[#allocation12 + $0x10] sm:$0xff] %v1439_v38  ;;  %486 = vmatmul.f32.vlgmr.msra.gmra.mxu2 %v1439_v38  ;;  %506 = vmatmul.f32.vlgmr.msra.gmra.mxu3 %v1439_v38 }
 0x221   :  { %746 = vmatpush.msra.mxu2 %v1082_v0  ;;  %766 = vmatpush.msra.mxu3 %v1092_v4  ;;  %v158_v0 = vadd.f32 %v1415_v35, %v1315_v39 }
 0x223   :  { %747 = vmatpush.msra.mxu2 %v1084_v1  ;;  %767 = vmatpush.msra.mxu3 %v1096_v5 }
 0x225   :  { %748 = vmatpush.msra.mxu2 %v1087_v2  ;;  %768 = vmatpush.msra.mxu3 %v1100_v7  ;;  %v199_v7 = vadd.f32 %v1419_v41, %v1320_v48 }
 0x227   :  { %749 = vmatpush.msra.mxu2 %v1090_v3  ;;  %769 = vmatpush.msra.mxu3 %v1106_v11 }
 0x229   :  { %750 = vmatpush.msra.mxu2 %v1098_v6  ;;  %770 = vmatpush.msra.mxu3 %v1112_v14 }
 0x22b   :  { %751 = vmatpush.msra.mxu2 %v1104_v10  ;;  %771 = vmatpush.msra.mxu3 %v1118_v16 }
 0x22d   :  { %752 = vmatpush.msra.mxu2 %v1110_v13  ;;  %772 = vmatpush.msra.mxu3 %v1125_v20 }
 0x22f   :  { %753 = vmatpush.msra.mxu2 %v1116_v15  ;;  %773 = vmatpush.msra.mxu3 %v1132_v22 }
 0x231   :  { %754 = vmatpush.msra.mxu2 %v1123_v19  ;;  %774 = vmatpush.msra.mxu3 %v1139_v24 }
 0x233   :  { %755 = vmatpush.msra.mxu2 %v1130_v21  ;;  %775 = vmatpush.msra.mxu3 %v1147_v26 }
 0x235   :  { %756 = vmatpush.msra.mxu2 %v1137_v23  ;;  %776 = vmatpush.msra.mxu3 %v1155_v28  ;;  %v161_v28 = vadd.f32 %v1417_v40, %v1315_v39 }
 0x237   :  { %757 = vmatpush.msra.mxu2 %v1145_v25  ;;  %777 = vmatpush.msra.mxu3 %v1163_v30 }
 0x239   :  { %758 = vmatpush.msra.mxu2 %v1153_v27  ;;  %778 = vmatpush.msra.mxu3 %v1171_v32 }
 0x23b   :  { %759 = vmatpush.msra.mxu2 %v1161_v29  ;;  %779 = vmatpush.msra.mxu3 %v1179_v34 }
 0x23d   :  { %760 = vmatpush.msra.mxu2 %v1169_v31  ;;  %780 = vmatpush.msra.mxu3 %v1187_v36  ;;  %v202_v36 = vadd.f32 %v1423_v43, %v1320_v48  ;;  %v164_v43 = vadd.f32 %v1421_v42, %v1315_v39 }
 0x23f   :  { %761 = vmatpush.msra.mxu2 %v1177_v33  ;;  %781 = vmatpush.msra.mxu3 %v1194_v37 }
 0x2a3   :  { %v487_v1 = vpop.f32.mrf.mxu2  ;;  %v507_v6 = vpop.f32.mrf.mxu3 }
 0x2a4   :  { %v510_v2 = vadd.f32 %v487_v1, %v158_v0  ;;  %v511_v13 = vadd.f32 %v507_v6, %v199_v7 }
 0x2a6   :  { %v854_v3 = vmul.f32 -1.442695, %v510_v2  ;;  %v531_v20 = vmax.f32 %v511_v13, 0.0 }
 0x2a8   :  { %880 = vpow2.f32 %v854_v3  ;;  %v532_v24 = vsub.f32 %v531_v20, %v1439_v38 }
 0x2ae   :  { %v881_v4 = vpop.eup %880 }
 0x2af   :  { %v515_v5 = vadd.f32 1.0, %v881_v4 }
 0x2b1   :  { %882 = vrcp.f32 %v515_v5  ;;  %v527_v15 = vand.u32 2147483648, %v515_v5  ;;  %v525_v19 = vand.u32 2147483647, %v515_v5  ;;  %vm521_vm14 = vweird.f32 %v515_v5 }
 0x2b3   :  { %v528_v22 = vor.u32 1.1754944e-38, %v527_v15  ;;  %vm526_vm0 = vcmp.eq.f32.partialorder %v525_v19, 8.507059e+37 }
 0x2b7   :  { %v883_v10 = vpop.eup %882 }
 0x2b8   :  { %v517_v11 = vmul.f32 %v883_v10, %v515_v5  ;;  %vm522_vm13 = vweird.f32 %v883_v10 }
 0x2b9   :  { %vm523_vm15 = vmor %vm521_vm14, %vm522_vm13 }
 0x2ba   :  { %v518_v14 = vsub.f32 1.0, %v517_v11 }
 0x2bc   :  { %v519_v16 = vmul.f32 %v883_v10, %v518_v14 }
 0x2be   :  { %v520_v21 = vadd.f32 %v883_v10, %v519_v16 }
 0x2c0   :  { %v524_v23 = vsel %vm523_vm15, %v883_v10, %v520_v21 }
 0x2c1   :  { %v529_v25 = vsel %vm526_vm0, %v528_v22, %v524_v23  ;;  %v208_v23 = vadd.f32 %v1431_v47, %v1320_v48  ;;  %v170_v47 = vadd.f32 %v1429_v46, %v1315_v39 }
 0x2c2   :  { %v533_v26 = vmul.f32 %v532_v24, %v529_v25 }
 0x2c4   :  { %v534_v27 = vadd.f32 %v533_v26, %v1439_v38 }
 0x2c6   :  { %536 = vst [vmem:[#allocation12 + $0x18] sm:$0xff] %v534_v27  ;;  %555 = vmatmul.f32.vlgmr.msra.gmra.mxu0 %v534_v27  ;;  %575 = vmatmul.f32.vlgmr.msra.gmra.mxu1 %v534_v27 }
 0x343   :  { %v556_v29 = vpop.f32.mrf.mxu0  ;;  %v576_v34 = vpop.f32.mrf.mxu1 }
 0x344   :  { %v579_v30 = vadd.f32 %v556_v29, %v161_v28  ;;  %v580_v35 = vadd.f32 %v576_v34, %v202_v36 }
 0x346   :  { %v855_v31 = vmul.f32 -1.442695, %v579_v30  ;;  %v600_v40 = vmax.f32 %v580_v35, 0.0 }
 0x348   :  { %884 = vpow2.f32 %v855_v31  ;;  %v601_v60 = vsub.f32 %v600_v40, %v534_v27 }
 0x34e   :  { %v885_v32 = vpop.eup %884 }
 0x34f   :  { %v584_v33 = vadd.f32 1.0, %v885_v32 }
 0x351   :  { %886 = vrcp.f32 %v584_v33  ;;  %v596_v54 = vand.u32 2147483648, %v584_v33  ;;  %v594_v56 = vand.u32 2147483647, %v584_v33  ;;  %vm590_vm2 = vweird.f32 %v584_v33 }
 0x353   :  { %v597_v58 = vor.u32 1.1754944e-38, %v596_v54  ;;  %vm595_vm4 = vcmp.eq.f32.partialorder %v594_v56, 8.507059e+37 }
 0x357   :  { %v887_v37 = vpop.eup %886 }
 0x358   :  { %v586_v17 = vmul.f32 %v887_v37, %v584_v33  ;;  %vm591_vm1 = vweird.f32 %v887_v37 }
 0x359   :  { %vm592_vm3 = vmor %vm590_vm2, %vm591_vm1 }
 0x35a   :  { %v587_v41 = vsub.f32 1.0, %v586_v17 }
 0x35c   :  { %v588_v55 = vmul.f32 %v887_v37, %v587_v41 }
 0x35e   :  { %v589_v57 = vadd.f32 %v887_v37, %v588_v55 }
 0x360   :  { %v593_v59 = vsel %vm592_vm3, %v887_v37, %v589_v57  ;;  %v211_v57 = vadd.f32 %v1434_v53, %v1320_v48 }
 0x361   :  { %v598_v61 = vsel %vm595_vm4, %v597_v58, %v593_v59 }
 0x362   :  { %v602_v62 = vmul.f32 %v601_v60, %v598_v61 }
 0x364   :  { %v603_v63 = vadd.f32 %v602_v62, %v534_v27 }
 0x366   :  { %605 = vst [vmem:[#allocation12 + $0x20] sm:$0xff] %v603_v63  ;;  %624 = vmatmul.f32.vlgmr.msrb.gmra.mxu2 %v603_v63  ;;  %644 = vmatmul.f32.vlgmr.msrb.gmra.mxu3 %v603_v63 }
 0x3e9   :  { %v625_v8 = vpop.f32.mrf.mxu2  ;;  %v645_v50 = vpop.f32.mrf.mxu3 }
 0x3ea   :  { %v648_v9 = vadd.f32 %v625_v8, %v164_v43  ;;  %v649_v0 = vadd.f32 %v645_v50, %v205_v51 }
 0x3ec   :  { %v856_v12 = vmul.f32 -1.442695, %v648_v9  ;;  %v669_v42 = vmax.f32 %v649_v0, 0.0 }
 0x3ee   :  { %888 = vpow2.f32 %v856_v12  ;;  %v670_v10 = vsub.f32 %v669_v42, %v603_v63 }
 0x3f4   :  { %v889_v18 = vpop.eup %888 }
 0x3f5   :  { %v653_v49 = vadd.f32 1.0, %v889_v18 }
 0x3f7   :  { %890 = vrcp.f32 %v653_v49  ;;  %v665_v2 = vand.u32 2147483648, %v653_v49  ;;  %v663_v4 = vand.u32 2147483647, %v653_v49  ;;  %vm659_vm6 = vweird.f32 %v653_v49 }
 0x3f9   :  { %v666_v6 = vor.u32 1.1754944e-38, %v665_v2  ;;  %vm664_vm8 = vcmp.eq.f32.partialorder %v663_v4, 8.507059e+37 }
 0x3fd   :  { %v891_v52 = vpop.eup %890 }
 0x3fe   :  { %v655_v38 = vmul.f32 %v891_v52, %v653_v49  ;;  %vm660_vm5 = vweird.f32 %v891_v52 }
 0x3ff   :  { %vm661_vm7 = vmor %vm659_vm6, %vm660_vm5 }
 0x400   :  { %v656_v1 = vsub.f32 1.0, %v655_v38 }
 0x402   :  { %v657_v3 = vmul.f32 %v891_v52, %v656_v1 }
 0x404   :  { %v658_v5 = vadd.f32 %v891_v52, %v657_v3 }
 0x406   :  { %v662_v7 = vsel %vm661_vm7, %v891_v52, %v658_v5 }
 0x407   :  { %v667_v11 = vsel %vm664_vm8, %v666_v6, %v662_v7 }
 0x408   :  { %v671_v13 = vmul.f32 %v670_v10, %v667_v11 }
 0x40a   :  { %v672_v14 = vadd.f32 %v671_v13, %v603_v63 }
 0x40c   :  { %674 = vst [vmem:[#allocation12 + $0x28] sm:$0xff] %v672_v14  ;;  %693 = vmatmul.f32.vlgmr.msrb.gmra.mxu0 %v672_v14  ;;  %713 = vmatmul.f32.vlgmr.msrb.gmra.mxu1 %v672_v14 }
 0x489   :  { %v694_v15 = vpop.f32.mrf.mxu0  ;;  %v714_v22 = vpop.f32.mrf.mxu1 }
 0x48a   :  { %v717_v16 = vadd.f32 %v694_v15, %v167_v45  ;;  %v718_v26 = vadd.f32 %v714_v22, %v208_v23 }
 0x48c   :  { %v857_v19 = vmul.f32 -1.442695, %v717_v16  ;;  %v738_v44 = vmax.f32 %v718_v26, 0.0 }
 0x48e   :  { %892 = vpow2.f32 %v857_v19  ;;  %v739_v34 = vsub.f32 %v738_v44, %v672_v14 }
 0x494   :  { %v893_v20 = vpop.eup %892 }
 0x495   :  { %v722_v21 = vadd.f32 1.0, %v893_v20 }
 0x497   :  { %894 = vrcp.f32 %v722_v21  ;;  %v734_v28 = vand.u32 2147483648, %v722_v21  ;;  %v732_v30 = vand.u32 2147483647, %v722_v21  ;;  %vm728_vm10 = vweird.f32 %v722_v21 }
 0x499   :  { %v735_v32 = vor.u32 1.1754944e-38, %v734_v28  ;;  %vm733_vm12 = vcmp.eq.f32.partialorder %v732_v30, 8.507059e+37 }
 0x49d   :  { %v895_v24 = vpop.eup %894 }
 0x49e   :  { %v724_v25 = vmul.f32 %v895_v24, %v722_v21  ;;  %vm729_vm9 = vweird.f32 %v895_v24 }
 0x49f   :  { %vm730_vm11 = vmor %vm728_vm10, %vm729_vm9 }
 0x4a0   :  { %v725_v27 = vsub.f32 1.0, %v724_v25 }
 0x4a2   :  { %v726_v29 = vmul.f32 %v895_v24, %v725_v27 }
 0x4a4   :  { %v727_v31 = vadd.f32 %v895_v24, %v726_v29 }
 0x4a6   :  { %v731_v33 = vsel %vm730_vm11, %v895_v24, %v727_v31 }
 0x4a7   :  { %v736_v36 = vsel %vm733_vm12, %v735_v32, %v731_v33 }
 0x4a8   :  { %v740_v37 = vmul.f32 %v739_v34, %v736_v36 }
 0x4aa   :  { %v741_v17 = vadd.f32 %v740_v37, %v672_v14 }
 0x4ac   :  { %743 = vst [vmem:[#allocation12 + $0x30] sm:$0xff] %v741_v17  ;;  %762 = vmatmul.f32.vlgmr.msra.gmra.mxu2 %v741_v17  ;;  %782 = vmatmul.f32.vlgmr.msra.gmra.mxu3 %v741_v17 }
 0x52f   :  { %v763_v35 = vpop.f32.mrf.mxu2  ;;  %v783_v40 = vpop.f32.mrf.mxu3 }
 0x530   :  { %v786_v41 = vadd.f32 %v763_v35, %v170_v47  ;;  %v787_v60 = vadd.f32 %v783_v40, %v211_v57 }
 0x532   :  { %v858_v54 = vmul.f32 -1.442695, %v786_v41  ;;  %v807_v39 = vmax.f32 %v787_v60, 0.0 }
 0x534   :  { %896 = vpow2.f32 %v858_v54  ;;  %v808_v12 = vsub.f32 %v807_v39, %v741_v17 }
 0x53a   :  { %v897_v55 = vpop.eup %896 }
 0x53b   :  { %v791_v56 = vadd.f32 1.0, %v897_v55 }
 0x53d   :  { %898 = vrcp.f32 %v791_v56  ;;  %v803_v62 = vand.u32 2147483648, %v791_v56  ;;  %v801_v43 = vand.u32 2147483647, %v791_v56  ;;  %vm797_vm14 = vweird.f32 %v791_v56 }
 0x53f   :  { %v804_v8 = vor.u32 1.1754944e-38, %v803_v62  ;;  %vm802_vm0 = vcmp.eq.f32.partialorder %v801_v43, 8.507059e+37 }
 0x543   :  { %v899_v58 = vpop.eup %898 }
 0x544   :  { %v793_v59 = vmul.f32 %v899_v58, %v791_v56  ;;  %vm798_vm13 = vweird.f32 %v899_v58 }
 0x545   :  { %vm799_vm15 = vmor %vm797_vm14, %vm798_vm13 }
 0x546   :  { %v794_v61 = vsub.f32 1.0, %v793_v59 }
 0x548   :  { %v795_v63 = vmul.f32 %v899_v58, %v794_v61 }
 0x54a   :  { %v796_v46 = vadd.f32 %v899_v58, %v795_v63 }
 0x54c   :  { %v800_v9 = vsel %vm799_vm15, %v899_v58, %v796_v46 }
 0x54d   :  { %v805_v18 = vsel %vm802_vm0, %v804_v8, %v800_v9 }
 0x54e   :  { %v809_v48 = vmul.f32 %v808_v12, %v805_v18 }
 0x550   :  { %v810_v53 = vadd.f32 %v809_v48, %v741_v17 }
 0x552   :  { %812 = vst [vmem:[#allocation12 + $0x38] sm:$0xff] %v810_v53 }
 0x553   :  { %826 = dma.vmem_to_hbm [thread:$0]  %s819_s15, 1024, %s821_s18, [#allocation6], %s1030_s28, %s1030_s28, %s1031_s29  }
 0x554   :  { %1026 = dma.done.wait [#allocation6], 1024  }
 0x555   :  { %1027 = vsyncadd [#allocation6], 4294966272 }
 0x556   :  { %831 = vsyncpa [#allocation5], 1 }
 0x557   :  { %832 = vsyncpa [#allocation8], 1 }
 0x558   :  { %833 = vsyncpa [#allocation11], 1 }
 0x559   :  { %834 = vsyncpa [#allocation6], 1 }

// kernel: tpu_custom_call.1
= control target key start
LH: loop header
LB: loop body
LE: loop exit
PB: predicated region body
PF: predicated region fallthrough
CT: control target
= control target key end

     0   :  { %10 = vsyncpa [#allocation5], 0  ;;  %s1504_s0 = inlined_call_operand.hbm [shape: f32[8,8,16], index: 0, kind: input, shape index: {}]   ;;  %s1505_s1 = inlined_call_operand.hbm [shape: f32[8,128], index: 1, kind: input, shape index: {}]   ;;  %s1506_s2 = inlined_call_operand.hbm [shape: f32[16,256], index: 2, kind: input, shape index: {}]   ;;  %s1507_s3 = inlined_call_operand.hbm [shape: f32[128,256], index: 3, kind: input, shape index: {}]   ;;  %s1508_s4 = inlined_call_operand.vmem [shape: f32[1,256], index: 4, kind: input, shape index: {}]   ;;  %s1509_s5 = inlined_call_operand.hbm [shape: f32[8,8,128], index: 5, kind: output, shape index: {}]  }
   0x1   :  { %11 = vsyncpa [#allocation8], 0 }
   0x2   :  { %12 = vsyncpa [#allocation11], 0  ;;  %s32_s20 = sshll.u32 %s1505_s1, 4  ;;  %s33_s20 = int_to_ptr.hbm [resolvable:$true] %s32_s20 }
   0x3   :  { %13 = vsyncpa [#allocation6], 0  ;;  %s1028_s21 = smov [#allocation7]   ;;  %s18_s25 = sshll.u32 %s1504_s0, 4  ;;  %s19_s25 = int_to_ptr.hbm [resolvable:$true] %s18_s25 }
   0x4   :  { %s34_s22 = sshll.u32 %s1028_s21, 4  ;;  %s1029_s26 = smov [#allocation4]   ;;  %s35_s22 = int_to_ptr.vmem [resolvable:$true] %s34_s22 }
   0x5   :  { %37 = dma.hbm_to_vmem [thread:$0]  %s33_s20, 128, %s35_s22, [#allocation8]  }
   0x6   :  { %s20_s27 = sshll.u32 %s1029_s26, 4  ;;  %s1030_s28 = smov 128   ;;  %s21_s27 = int_to_ptr.vmem [resolvable:$true] %s20_s27 }
   0x7   :  { %s1031_s29 = smov 8   ;;  %s42_s6 = sshll.u32 %s1506_s2, 4  ;;  %s43_s6 = int_to_ptr.hbm [resolvable:$true] %s42_s6 }
   0x8   :  { %26 = dma.hbm_to_vmem [thread:$0]  %s19_s25, 1024, %s21_s27, [#allocation5], %s1030_s28, %s1030_s28, %s1031_s29  }
   0x9   :  { %s1032_s7 = smov [#allocation9]   ;;  %s55_s10 = sshll.u32 %s1507_s3, 4  ;;  %s56_s10 = int_to_ptr.hbm [resolvable:$true] %s55_s10 }
   0xa   :  { %s44_s8 = sshll.u32 %s1032_s7, 4  ;;  %s1033_s11 = smov 256   ;;  %s45_s8 = int_to_ptr.vmem [resolvable:$true] %s44_s8 }
   0xb   :  { %s1034_s12 = smov 16   ;;  %s1035_s13 = smov [#allocation10]  }
   0xc   :  { %50 = dma.hbm_to_vmem [thread:$0]  %s43_s6, 512, %s45_s8, [#allocation8], %s1033_s11, %s1033_s11, %s1034_s12  }
   0xd   :  { %s57_s14 = sshll.u32 %s1035_s13, 4  ;;  %s58_s14 = int_to_ptr.vmem [resolvable:$true] %s57_s14 }
   0xe   :  { %63 = dma.hbm_to_vmem [thread:$0]  %s56_s10, 4096, %s58_s14, [#allocation11], %s1033_s11, %s1033_s11, %s1034_s12  }
   0xf   :  { %1020 = dma.done.wait [#allocation5], 1024  }
  0x10   :  { %1021 = vsyncadd [#allocation5], 4294966272 }
  0x11   :  { %1022 = dma.done.wait [#allocation8], 640  }
  0x12   :  { %1023 = vsyncadd [#allocation8], 4294966656 }
  0x13   :  { %1024 = dma.done.wait [#allocation11], 4096  }
  0x14   :  { %1025 = vsyncadd [#allocation11], 4294963200  ;;  %v1082_v0 = vld [vmem:[#allocation10 + $0xf0] sm:$0xff]  ;;  %v1084_v1 = vld [vmem:[#allocation10 + $0xe0] sm:$0xff]  ;;  %vm106_vm0 = vcmask 130048   ;;  %s820_s18 = sshll.u32 %s1509_s5, 4  ;;  %s821_s18 = int_to_ptr.hbm [resolvable:$true] %s820_s18 }
  0x15   :  { %264 = vmatpush.msra.mxu2 %v1082_v0  ;;  %v1087_v2 = vld [vmem:[#allocation10 + $0xd0] sm:$0xff]  ;;  %v1090_v3 = vld [vmem:[#allocation10 + $0xc0] sm:$0xff]  ;;  %v1092_v4 = vld [vmem:[#allocation10 + $0xf8] sm:$0xff] }
  0x16   :  { %284 = vmatpush.msra.mxu3 %v1092_v4  ;;  %v1096_v5 = vld [vmem:[#allocation10 + $0xe8] sm:$0xff]  ;;  %v1098_v6 = vld [vmem:[#allocation10 + $0xb0] sm:$0xff]  ;;  %v1100_v7 = vld [vmem:[#allocation10 + $0xd8] sm:$0xff] }
  0x17   :  { %265 = vmatpush.msra.mxu2 %v1084_v1  ;;  %v98_v8 = vld [vmem:[#allocation9 + $0x10] sm:$0xff]  ;;  %v96_v9 = vld [vmem:[#allocation9] sm:$0xff]  ;;  %v1106_v11 = vld [vmem:[#allocation10 + $0xc8] sm:$0xff] }
  0x18   :  { %285 = vmatpush.msra.mxu3 %v1096_v5  ;;  %v1104_v10 = vld [vmem:[#allocation10 + $0xa0] sm:$0xff]  ;;  %145 = vmatpush.msra.mxu0 %v98_v8  ;;  %v88_v12 = vld [vmem:[#allocation4] sm:$0xff]  ;;  %v1110_v13 = vld [vmem:[#allocation10 + $0x90] sm:$0xff] }
  0x19   :  { %266 = vmatpush.msra.mxu2 %v1087_v2  ;;  %v1112_v14 = vld [vmem:[#allocation10 + $0xb8] sm:$0xff]  ;;  %v1116_v15 = vld [vmem:[#allocation10 + $0x80] sm:$0xff]  ;;  %v1118_v16 = vld [vmem:[#allocation10 + $0xa8] sm:$0xff] }
  0x1a   :  { %286 = vmatpush.msra.mxu3 %v1100_v7  ;;  %146 = vmatpush.msra.mxu0 %v96_v9  ;;  %v99_v17 = vld [vmem:[#allocation9 + $0x18] sm:$0xff]  ;;  %v97_v18 = vld [vmem:[#allocation9 + $0x8] sm:$0xff]  ;;  %v1123_v19 = vld [vmem:[#allocation10 + $0x70] sm:$0xff] }
  0x1b   :  { %267 = vmatpush.msra.mxu2 %v1090_v3  ;;  %835 = vmatmul.msk.f32.vlgmr.msra.gmra.mxu0 %vm106_vm0, %v88_v12  ;;  %v1125_v20 = vld [vmem:[#allocation10 + $0x98] sm:$0xff]  ;;  %v1130_v21 = vld [vmem:[#allocation10 + $0x60] sm:$0xff]  ;;  %v1132_v22 = vld [vmem:[#allocation10 + $0x88] sm:$0xff] }
  0x1c   :  { %287 = vmatpush.msra.mxu3 %v1106_v11  ;;  %186 = vmatpush.msra.mxu1 %v99_v17  ;;  %v1137_v23 = vld [vmem:[#allocation10 + $0x50] sm:$0xff]  ;;  %v1139_v24 = vld [vmem:[#allocation10 + $0x78] sm:$0xff]  ;;  %v1145_v25 = vld [vmem:[#allocation10 + $0x40] sm:$0xff] }
  0x1d   :  { %268 = vmatpush.msra.mxu2 %v1098_v6  ;;  %401 = vmatpush.msrb.mxu0 %v1082_v0  ;;  %v1147_v26 = vld [vmem:[#allocation10 + $0x68] sm:$0xff]  ;;  %v1153_v27 = vld [vmem:[#allocation10 + $0x30] sm:$0xff]  ;;  %v1155_v28 = vld [vmem:[#allocation10 + $0x58] sm:$0xff] }
  0x1e   :  { %288 = vmatpush.msra.mxu3 %v1112_v14  ;;  %187 = vmatpush.msra.mxu1 %v97_v18  ;;  %v1161_v29 = vld [vmem:[#allocation10 + $0x20] sm:$0xff]  ;;  %v1163_v30 = vld [vmem:[#allocation10 + $0x48] sm:$0xff]  ;;  %v1169_v31 = vld [vmem:[#allocation10 + $0x10] sm:$0xff] }
  0x1f   :  { %269 = vmatpush.msra.mxu2 %v1104_v10  ;;  %402 = vmatpush.msrb.mxu0 %v1084_v1  ;;  %v1171_v32 = vld [vmem:[#allocation10 + $0x38] sm:$0xff]  ;;  %v1177_v33 = vld [vmem:[#allocation10] sm:$0xff]  ;;  %v1179_v34 = vld [vmem:[#allocation10 + $0x28] sm:$0xff] }
  0x20   :  { %289 = vmatpush.msra.mxu3 %v1118_v16  ;;  %843 = vmatmul.msk.f32.vlgmr.msra.gmra.mxu1 %vm106_vm0, %v88_v12  ;;  %v1184_v35 = vld [vmem:[#allocation7] sm:$0xff]  ;;  %v1194_v37 = vld [vmem:[#allocation10 + $0x8] sm:$0xff]  ;;  %v89_v45 = vld [vmem:[#allocation4 + $0x8] sm:$0xff] }
  0x21   :  { %270 = vmatpush.msra.mxu2 %v1110_v13  ;;  %403 = vmatpush.msrb.mxu0 %v1087_v2  ;;  %v1187_v36 = vld [vmem:[#allocation10 + $0x18] sm:$0xff]  ;;  %v90_v46 = vld [vmem:[#allocation4 + $0x10] sm:$0xff]  ;;  %v91_v53 = vld [vmem:[#allocation4 + $0x18] sm:$0xff] }
  0x22   :  { %290 = vmatpush.msra.mxu3 %v1125_v20  ;;  %421 = vmatpush.msrb.mxu1 %v1092_v4  ;;  %v100_v38 = vld [vmem:[%s1508_s4] sm:$0x3]  ;;  %s1036_s4 = smov [#allocation12]  }
  0x23   :  { %271 = vmatpush.msra.mxu2 %v1116_v15  ;;  %404 = vmatpush.msrb.mxu0 %v1090_v3  ;;  %v1315_v39 = vperm.slane %v100_v38, 0  ;;  %v1320_v48 = vperm.slane %v100_v38, 1  ;;  %v93_v38 = vld [vmem:[#allocation4 + $0x28] sm:$0xff]  ;;  %s818_s15 = sshll.u32 %s1036_s4, 4  ;;  %s819_s15 = int_to_ptr.vmem [resolvable:$true] %s818_s15 }
  0x24   :  { %291 = vmatpush.msra.mxu3 %v1132_v22  ;;  %422 = vmatpush.msrb.mxu1 %v1096_v5 }
  0x25   :  { %272 = vmatpush.msra.mxu2 %v1123_v19  ;;  %405 = vmatpush.msrb.mxu0 %v1098_v6 }
  0x26   :  { %292 = vmatpush.msra.mxu3 %v1139_v24  ;;  %423 = vmatpush.msrb.mxu1 %v1100_v7 }
  0x27   :  { %273 = vmatpush.msra.mxu2 %v1130_v21  ;;  %406 = vmatpush.msrb.mxu0 %v1104_v10 }
  0x28   :  { %293 = vmatpush.msra.mxu3 %v1147_v26  ;;  %424 = vmatpush.msrb.mxu1 %v1106_v11 }
  0x29   :  { %274 = vmatpush.msra.mxu2 %v1137_v23  ;;  %407 = vmatpush.msrb.mxu0 %v1110_v13 }
  0x2a   :  { %294 = vmatpush.msra.mxu3 %v1155_v28  ;;  %425 = vmatpush.msrb.mxu1 %v1112_v14 }
  0x2b   :  { %275 = vmatpush.msra.mxu2 %v1145_v25  ;;  %408 = vmatpush.msrb.mxu0 %v1116_v15 }
  0x2c   :  { %295 = vmatpush.msra.mxu3 %v1163_v30  ;;  %426 = vmatpush.msrb.mxu1 %v1118_v16 }
  0x2d   :  { %276 = vmatpush.msra.mxu2 %v1153_v27  ;;  %409 = vmatpush.msrb.mxu0 %v1123_v19 }
  0x2e   :  { %296 = vmatpush.msra.mxu3 %v1171_v32  ;;  %427 = vmatpush.msrb.mxu1 %v1125_v20 }
  0x2f   :  { %277 = vmatpush.msra.mxu2 %v1161_v29  ;;  %410 = vmatpush.msrb.mxu0 %v1130_v21 }
  0x30   :  { %297 = vmatpush.msra.mxu3 %v1179_v34  ;;  %428 = vmatpush.msrb.mxu1 %v1132_v22 }
  0x31   :  { %278 = vmatpush.msra.mxu2 %v1169_v31  ;;  %411 = vmatpush.msrb.mxu0 %v1137_v23 }
  0x32   :  { %298 = vmatpush.msra.mxu3 %v1187_v36  ;;  %429 = vmatpush.msrb.mxu1 %v1139_v24 }
  0x33   :  { %279 = vmatpush.msra.mxu2 %v1177_v33  ;;  %412 = vmatpush.msrb.mxu0 %v1145_v25 }
  0x34   :  { %280 = vmatmul.f32.vlgmr.msra.gmra.mxu2 %v1184_v35  ;;  %299 = vmatpush.msra.mxu3 %v1194_v37 }
  0x35   :  { %332 = vmatpush.msrb.mxu2 %v1082_v0  ;;  %300 = vmatmul.f32.vlgmr.msra.gmra.mxu3 %v1184_v35 }
  0x36   :  { %352 = vmatpush.msrb.mxu3 %v1092_v4  ;;  %413 = vmatpush.msrb.mxu0 %v1153_v27 }
  0x37   :  { %333 = vmatpush.msrb.mxu2 %v1084_v1  ;;  %430 = vmatpush.msrb.mxu1 %v1147_v26 }
  0x38   :  { %353 = vmatpush.msrb.mxu3 %v1096_v5  ;;  %414 = vmatpush.msrb.mxu0 %v1161_v29 }
  0x39   :  { %334 = vmatpush.msrb.mxu2 %v1087_v2  ;;  %431 = vmatpush.msrb.mxu1 %v1155_v28 }
  0x3a   :  { %354 = vmatpush.msrb.mxu3 %v1100_v7  ;;  %415 = vmatpush.msrb.mxu0 %v1169_v31 }
  0x3b   :  { %335 = vmatpush.msrb.mxu2 %v1090_v3  ;;  %432 = vmatpush.msrb.mxu1 %v1163_v30 }
  0x3c   :  { %355 = vmatpush.msrb.mxu3 %v1106_v11  ;;  %416 = vmatpush.msrb.mxu0 %v1177_v33 }
  0x3d   :  { %336 = vmatpush.msrb.mxu2 %v1098_v6  ;;  %433 = vmatpush.msrb.mxu1 %v1171_v32 }
  0x3e   :  { %356 = vmatpush.msrb.mxu3 %v1112_v14  ;;  %539 = vmatpush.msra.mxu0 %v1082_v0 }
  0x3f   :  { %337 = vmatpush.msrb.mxu2 %v1104_v10  ;;  %434 = vmatpush.msrb.mxu1 %v1179_v34 }
  0x40   :  { %357 = vmatpush.msrb.mxu3 %v1118_v16  ;;  %540 = vmatpush.msra.mxu0 %v1084_v1 }
  0x41   :  { %338 = vmatpush.msrb.mxu2 %v1110_v13  ;;  %435 = vmatpush.msrb.mxu1 %v1187_v36 }
  0x42   :  { %358 = vmatpush.msrb.mxu3 %v1125_v20  ;;  %541 = vmatpush.msra.mxu0 %v1087_v2 }
  0x43   :  { %339 = vmatpush.msrb.mxu2 %v1116_v15  ;;  %436 = vmatpush.msrb.mxu1 %v1194_v37 }
  0x44   :  { %359 = vmatpush.msrb.mxu3 %v1132_v22  ;;  %542 = vmatpush.msra.mxu0 %v1090_v3 }
  0x45   :  { %340 = vmatpush.msrb.mxu2 %v1123_v19  ;;  %559 = vmatpush.msra.mxu1 %v1092_v4 }
  0x46   :  { %360 = vmatpush.msrb.mxu3 %v1139_v24  ;;  %543 = vmatpush.msra.mxu0 %v1098_v6 }
  0x47   :  { %341 = vmatpush.msrb.mxu2 %v1130_v21  ;;  %560 = vmatpush.msra.mxu1 %v1096_v5 }
  0x48   :  { %361 = vmatpush.msrb.mxu3 %v1147_v26  ;;  %544 = vmatpush.msra.mxu0 %v1104_v10 }
  0x49   :  { %342 = vmatpush.msrb.mxu2 %v1137_v23  ;;  %561 = vmatpush.msra.mxu1 %v1100_v7 }
  0x4a   :  { %362 = vmatpush.msrb.mxu3 %v1155_v28  ;;  %545 = vmatpush.msra.mxu0 %v1110_v13 }
  0x4b   :  { %343 = vmatpush.msrb.mxu2 %v1145_v25  ;;  %562 = vmatpush.msra.mxu1 %v1106_v11 }
  0x4c   :  { %363 = vmatpush.msrb.mxu3 %v1163_v30  ;;  %546 = vmatpush.msra.mxu0 %v1116_v15 }
  0x4d   :  { %344 = vmatpush.msrb.mxu2 %v1153_v27  ;;  %563 = vmatpush.msra.mxu1 %v1112_v14 }
  0x4e   :  { %364 = vmatpush.msrb.mxu3 %v1171_v32  ;;  %547 = vmatpush.msra.mxu0 %v1123_v19 }
  0x4f   :  { %345 = vmatpush.msrb.mxu2 %v1161_v29  ;;  %564 = vmatpush.msra.mxu1 %v1118_v16 }
  0x50   :  { %365 = vmatpush.msrb.mxu3 %v1179_v34  ;;  %548 = vmatpush.msra.mxu0 %v1130_v21 }
  0x51   :  { %346 = vmatpush.msrb.mxu2 %v1169_v31  ;;  %565 = vmatpush.msra.mxu1 %v1125_v20 }
  0x52   :  { %366 = vmatpush.msrb.mxu3 %v1187_v36  ;;  %549 = vmatpush.msra.mxu0 %v1137_v23 }
  0x53   :  { %347 = vmatpush.msrb.mxu2 %v1177_v33  ;;  %566 = vmatpush.msra.mxu1 %v1132_v22 }
  0x54   :  { %367 = vmatpush.msrb.mxu3 %v1194_v37  ;;  %550 = vmatpush.msra.mxu0 %v1145_v25 }
  0x55   :  { %470 = vmatpush.msra.mxu2 %v1082_v0  ;;  %567 = vmatpush.msra.mxu1 %v1139_v24 }
  0x56   :  { %490 = vmatpush.msra.mxu3 %v1092_v4  ;;  %551 = vmatpush.msra.mxu0 %v1153_v27 }
  0x57   :  { %471 = vmatpush.msra.mxu2 %v1084_v1  ;;  %568 = vmatpush.msra.mxu1 %v1147_v26 }
  0x58   :  { %491 = vmatpush.msra.mxu3 %v1096_v5  ;;  %552 = vmatpush.msra.mxu0 %v1161_v29 }
  0x59   :  { %472 = vmatpush.msra.mxu2 %v1087_v2  ;;  %569 = vmatpush.msra.mxu1 %v1155_v28 }
  0x5a   :  { %492 = vmatpush.msra.mxu3 %v1100_v7  ;;  %553 = vmatpush.msra.mxu0 %v1169_v31 }
  0x5b   :  { %473 = vmatpush.msra.mxu2 %v1090_v3  ;;  %570 = vmatpush.msra.mxu1 %v1163_v30 }
  0x5c   :  { %493 = vmatpush.msra.mxu3 %v1106_v11  ;;  %554 = vmatpush.msra.mxu0 %v1177_v33 }
  0x5d   :  { %474 = vmatpush.msra.mxu2 %v1098_v6  ;;  %571 = vmatpush.msra.mxu1 %v1171_v32 }
  0x5e   :  { %494 = vmatpush.msra.mxu3 %v1112_v14  ;;  %836 = vmatmul.msk.f32.gmra.mxu0 %vm106_vm0, %v89_v45 }
  0x5f   :  { %475 = vmatpush.msra.mxu2 %v1104_v10  ;;  %572 = vmatpush.msra.mxu1 %v1179_v34 }
  0x60   :  { %495 = vmatpush.msra.mxu3 %v1118_v16  ;;  %844 = vmatmul.msk.f32.gmra.mxu1 %vm106_vm0, %v89_v45 }
  0x61   :  { %476 = vmatpush.msra.mxu2 %v1110_v13  ;;  %573 = vmatpush.msra.mxu1 %v1187_v36 }
  0x62   :  { %496 = vmatpush.msra.mxu3 %v1125_v20 }
  0x63   :  { %477 = vmatpush.msra.mxu2 %v1116_v15  ;;  %574 = vmatpush.msra.mxu1 %v1194_v37 }
  0x64   :  { %497 = vmatpush.msra.mxu3 %v1132_v22 }
  0x65   :  { %478 = vmatpush.msra.mxu2 %v1123_v19 }
  0x66   :  { %498 = vmatpush.msra.mxu3 %v1139_v24  ;;  %837 = vmatmul.msk.f32.gmra.mxu0 %vm106_vm0, %v90_v46 }
  0x67   :  { %479 = vmatpush.msra.mxu2 %v1130_v21 }
  0x68   :  { %499 = vmatpush.msra.mxu3 %v1147_v26  ;;  %845 = vmatmul.msk.f32.gmra.mxu1 %vm106_vm0, %v90_v46 }
  0x69   :  { %480 = vmatpush.msra.mxu2 %v1137_v23 }
  0x6a   :  { %500 = vmatpush.msra.mxu3 %v1155_v28 }
  0x6b   :  { %481 = vmatpush.msra.mxu2 %v1145_v25 }
  0x6c   :  { %501 = vmatpush.msra.mxu3 %v1163_v30 }
  0x6d   :  { %482 = vmatpush.msra.mxu2 %v1153_v27 }
  0x6e   :  { %502 = vmatpush.msra.mxu3 %v1171_v32  ;;  %838 = vmatmul.msk.f32.gmra.mxu0 %vm106_vm0, %v91_v53 }
  0x6f   :  { %483 = vmatpush.msra.mxu2 %v1161_v29 }
  0x70   :  { %503 = vmatpush.msra.mxu3 %v1179_v34  ;;  %846 = vmatmul.msk.f32.gmra.mxu1 %vm106_vm0, %v91_v53 }
  0x71   :  { %484 = vmatpush.msra.mxu2 %v1169_v31 }
  0x72   :  { %504 = vmatpush.msra.mxu3 %v1187_v36 }
  0x73   :  { %485 = vmatpush.msra.mxu2 %v1177_v33 }
  0x74   :  { %505 = vmatpush.msra.mxu3 %v1194_v37 }
  0x98   :  { %v148_v40 = vpop.f32.mrf.mxu0 }
  0x99   :  { %v149_v41 = vadd.f32 %v148_v40, %v1315_v39  ;;  %v94_v40 = vld [vmem:[#allocation4 + $0x30] sm:$0xff] }
  0x9d   :  { %v189_v50 = vpop.f32.mrf.mxu1 }
  0x9e   :  { %v190_v51 = vadd.f32 %v189_v50, %v1320_v48 }
  0xb7   :  { %v281_v42 = vpop.f32.mrf.mxu2 }
  0xb8   :  { %v304_v43 = vadd.f32 %v281_v42, %v149_v41  ;;  %v301_v52 = vpop.f32.mrf.mxu3  ;;  %v95_v42 = vld [vmem:[#allocation4 + $0x38] sm:$0xff] }
  0xb9   :  { %v305_v54 = vadd.f32 %v301_v52, %v190_v51 }
  0xba   :  { %v851_v44 = vmul.f32 -1.442695, %v304_v43 }
  0xbb   :  { %v325_v58 = vmax.f32 %v305_v54, 0.0 }
  0xbc   :  { %868 = vpow2.f32 %v851_v44 }
  0xbd   :  { %v326_v63 = vsub.f32 %v325_v58, %v1184_v35 }
  0xc2   :  { %v869_v47 = vpop.eup %868 }
  0xc3   :  { %v309_v49 = vadd.f32 1.0, %v869_v47 }
  0xc5   :  { %870 = vrcp.f32 %v309_v49  ;;  %v321_v59 = vand.u32 2147483648, %v309_v49  ;;  %v319_v61 = vand.u32 2147483647, %v309_v49  ;;  %vm315_vm2 = vweird.f32 %v309_v49 }
  0xc7   :  { %v322_v8 = vor.u32 1.1754944e-38, %v321_v59  ;;  %vm320_vm4 = vcmp.eq.f32.partialorder %v319_v61, 8.507059e+37 }
  0xcb   :  { %v871_v55 = vpop.eup %870 }
  0xcc   :  { %v311_v56 = vmul.f32 %v871_v55, %v309_v49  ;;  %vm316_vm1 = vweird.f32 %v871_v55 }
  0xcd   :  { %vm317_vm3 = vmor %vm315_vm2, %vm316_vm1 }
  0xce   :  { %v312_v57 = vsub.f32 1.0, %v311_v56 }
  0xd0   :  { %v313_v60 = vmul.f32 %v871_v55, %v312_v57 }
  0xd2   :  { %v314_v62 = vadd.f32 %v871_v55, %v313_v60 }
  0xd4   :  { %v318_v9 = vsel %vm317_vm3, %v871_v55, %v314_v62 }
  0xd5   :  { %v323_v12 = vsel %vm320_vm4, %v322_v8, %v318_v9 }
  0xd6   :  { %v327_v17 = vmul.f32 %v326_v63, %v323_v12 }
  0xd8   :  { %v1329_v18 = vadd.f32 %v327_v17, %v1184_v35  ;;  %v92_v35 = vld [vmem:[#allocation4 + $0x20] sm:$0xff] }
  0xd9   :  { %839 = vmatmul.msk.f32.gmra.mxu0 %vm106_vm0, %v92_v35  ;;  %847 = vmatmul.msk.f32.gmra.mxu1 %vm106_vm0, %v92_v35 }
  0xda   :  { %329 = vst [vmem:[#allocation12] sm:$0xff] %v1329_v18  ;;  %348 = vmatmul.f32.vlgmr.msrb.gmra.mxu2 %v1329_v18  ;;  %368 = vmatmul.f32.vlgmr.msrb.gmra.mxu3 %v1329_v18 }
  0xdb   :  { %608 = vmatpush.msrb.mxu2 %v1082_v0  ;;  %628 = vmatpush.msrb.mxu3 %v1092_v4  ;;  %v151_v41 = vpop.f32.mrf.mxu0 }
  0xdc   :  { %v152_v43 = vadd.f32 %v151_v41, %v1315_v39 }
  0xdd   :  { %609 = vmatpush.msrb.mxu2 %v1084_v1  ;;  %629 = vmatpush.msrb.mxu3 %v1096_v5  ;;  %v192_v50 = vpop.f32.mrf.mxu1 }
  0xde   :  { %v193_v51 = vadd.f32 %v192_v50, %v1320_v48 }
  0xdf   :  { %610 = vmatpush.msrb.mxu2 %v1087_v2  ;;  %630 = vmatpush.msrb.mxu3 %v1100_v7 }
  0xe1   :  { %611 = vmatpush.msrb.mxu2 %v1090_v3  ;;  %631 = vmatpush.msrb.mxu3 %v1106_v11 }
  0xe2   :  { %840 = vmatmul.msk.f32.gmra.mxu0 %vm106_vm0, %v93_v38  ;;  %848 = vmatmul.msk.f32.gmra.mxu1 %vm106_vm0, %v93_v38 }
  0xe3   :  { %612 = vmatpush.msrb.mxu2 %v1098_v6  ;;  %632 = vmatpush.msrb.mxu3 %v1112_v14 }
  0xe5   :  { %613 = vmatpush.msrb.mxu2 %v1104_v10  ;;  %633 = vmatpush.msrb.mxu3 %v1118_v16  ;;  %v195_v38 = vpop.f32.mrf.mxu1 }
  0xe7   :  { %614 = vmatpush.msrb.mxu2 %v1110_v13  ;;  %634 = vmatpush.msrb.mxu3 %v1125_v20 }
  0xe9   :  { %615 = vmatpush.msrb.mxu2 %v1116_v15  ;;  %635 = vmatpush.msrb.mxu3 %v1132_v22 }
  0xea   :  { %841 = vmatmul.msk.f32.gmra.mxu0 %vm106_vm0, %v94_v40  ;;  %849 = vmatmul.msk.f32.gmra.mxu1 %vm106_vm0, %v94_v40 }
  0xeb   :  { %616 = vmatpush.msrb.mxu2 %v1123_v19  ;;  %636 = vmatpush.msrb.mxu3 %v1139_v24 }
  0xed   :  { %617 = vmatpush.msrb.mxu2 %v1130_v21  ;;  %637 = vmatpush.msrb.mxu3 %v1147_v26  ;;  %v1419_v41 = vpop.f32.mrf.mxu1 }
  0xef   :  { %618 = vmatpush.msrb.mxu2 %v1137_v23  ;;  %638 = vmatpush.msrb.mxu3 %v1155_v28 }
  0xf1   :  { %619 = vmatpush.msrb.mxu2 %v1145_v25  ;;  %639 = vmatpush.msrb.mxu3 %v1163_v30 }
  0xf2   :  { %842 = vmatmul.msk.f32.gmra.mxu0 %vm106_vm0, %v95_v42  ;;  %850 = vmatmul.msk.f32.gmra.mxu1 %vm106_vm0, %v95_v42 }
  0xf3   :  { %620 = vmatpush.msrb.mxu2 %v1153_v27  ;;  %640 = vmatpush.msrb.mxu3 %v1171_v32 }
  0xf5   :  { %621 = vmatpush.msrb.mxu2 %v1161_v29  ;;  %641 = vmatpush.msrb.mxu3 %v1179_v34 }
  0xf7   :  { %622 = vmatpush.msrb.mxu2 %v1169_v31  ;;  %642 = vmatpush.msrb.mxu3 %v1187_v36 }
  0xf9   :  { %623 = vmatpush.msrb.mxu2 %v1177_v33  ;;  %643 = vmatpush.msrb.mxu3 %v1194_v37 }
 0x15d   :  { %v349_v44 = vpop.f32.mrf.mxu2  ;;  %v369_v52 = vpop.f32.mrf.mxu3 }
 0x15e   :  { %v372_v45 = vadd.f32 %v349_v44, %v152_v43  ;;  %v373_v55 = vadd.f32 %v369_v52, %v193_v51  ;;  %v1423_v43 = vpop.f32.mrf.mxu1 }
 0x160   :  { %v852_v46 = vmul.f32 -1.442695, %v372_v45  ;;  %v393_v60 = vmax.f32 %v373_v55, 0.0 }
 0x162   :  { %872 = vpow2.f32 %v852_v46  ;;  %v394_v8 = vsub.f32 %v393_v60, %v1329_v18 }
 0x166   :  { %v1427_v45 = vpop.f32.mrf.mxu1 }
 0x168   :  { %v873_v47 = vpop.eup %872 }
 0x169   :  { %v377_v49 = vadd.f32 1.0, %v873_v47 }
 0x16b   :  { %874 = vrcp.f32 %v377_v49  ;;  %v389_v57 = vand.u32 2147483648, %v377_v49  ;;  %v387_v59 = vand.u32 2147483647, %v377_v49  ;;  %vm383_vm6 = vweird.f32 %v377_v49 }
 0x16d   :  { %v390_v62 = vor.u32 1.1754944e-38, %v389_v57  ;;  %vm388_vm8 = vcmp.eq.f32.partialorder %v387_v59, 8.507059e+37  ;;  %v196_v57 = vadd.f32 %v195_v38, %v1320_v48 }
 0x16e   :  { %v1431_v47 = vpop.f32.mrf.mxu1 }
 0x171   :  { %v875_v53 = vpop.eup %874 }
 0x172   :  { %v379_v54 = vmul.f32 %v875_v53, %v377_v49  ;;  %vm384_vm5 = vweird.f32 %v875_v53 }
 0x173   :  { %vm385_vm7 = vmor %vm383_vm6, %vm384_vm5 }
 0x174   :  { %v380_v56 = vsub.f32 1.0, %v379_v54 }
 0x176   :  { %v381_v58 = vmul.f32 %v875_v53, %v380_v56 }
 0x178   :  { %v382_v61 = vadd.f32 %v875_v53, %v381_v58 }
 0x17a   :  { %v386_v63 = vsel %vm385_vm7, %v875_v53, %v382_v61  ;;  %v1434_v53 = vpop.f32.mrf.mxu1 }
 0x17b   :  { %v391_v9 = vsel %vm388_vm8, %v390_v62, %v386_v63 }
 0x17c   :  { %v395_v12 = vmul.f32 %v394_v8, %v391_v9 }
 0x17e   :  { %v1378_v17 = vadd.f32 %v395_v12, %v1329_v18  ;;  %v154_v18 = vpop.f32.mrf.mxu0 }
 0x17f   :  { %v155_v49 = vadd.f32 %v154_v18, %v1315_v39 }
 0x180   :  { %398 = vst [vmem:[#allocation12 + $0x8] sm:$0xff] %v1378_v17  ;;  %417 = vmatmul.f32.vlgmr.msrb.gmra.mxu0 %v1378_v17  ;;  %437 = vmatmul.f32.vlgmr.msrb.gmra.mxu1 %v1378_v17 }
 0x181   :  { %677 = vmatpush.msrb.mxu0 %v1082_v0  ;;  %697 = vmatpush.msrb.mxu1 %v1092_v4 }
 0x183   :  { %678 = vmatpush.msrb.mxu0 %v1084_v1  ;;  %698 = vmatpush.msrb.mxu1 %v1096_v5 }
 0x185   :  { %679 = vmatpush.msrb.mxu0 %v1087_v2  ;;  %699 = vmatpush.msrb.mxu1 %v1100_v7 }
 0x186   :  { %v1415_v35 = vpop.f32.mrf.mxu0 }
 0x187   :  { %680 = vmatpush.msrb.mxu0 %v1090_v3  ;;  %700 = vmatpush.msrb.mxu1 %v1106_v11 }
 0x189   :  { %681 = vmatpush.msrb.mxu0 %v1098_v6  ;;  %701 = vmatpush.msrb.mxu1 %v1112_v14 }
 0x18b   :  { %682 = vmatpush.msrb.mxu0 %v1104_v10  ;;  %702 = vmatpush.msrb.mxu1 %v1118_v16 }
 0x18d   :  { %683 = vmatpush.msrb.mxu0 %v1110_v13  ;;  %703 = vmatpush.msrb.mxu1 %v1125_v20 }
 0x18e   :  { %v1417_v40 = vpop.f32.mrf.mxu0 }
 0x18f   :  { %684 = vmatpush.msrb.mxu0 %v1116_v15  ;;  %704 = vmatpush.msrb.mxu1 %v1132_v22 }
 0x191   :  { %685 = vmatpush.msrb.mxu0 %v1123_v19  ;;  %705 = vmatpush.msrb.mxu1 %v1139_v24 }
 0x193   :  { %686 = vmatpush.msrb.mxu0 %v1130_v21  ;;  %706 = vmatpush.msrb.mxu1 %v1147_v26 }
 0x195   :  { %687 = vmatpush.msrb.mxu0 %v1137_v23  ;;  %707 = vmatpush.msrb.mxu1 %v1155_v28 }
 0x196   :  { %v1421_v42 = vpop.f32.mrf.mxu0 }
 0x197   :  { %688 = vmatpush.msrb.mxu0 %v1145_v25  ;;  %708 = vmatpush.msrb.mxu1 %v1163_v30 }
 0x199   :  { %689 = vmatpush.msrb.mxu0 %v1153_v27  ;;  %709 = vmatpush.msrb.mxu1 %v1171_v32 }
 0x19b   :  { %690 = vmatpush.msrb.mxu0 %v1161_v29  ;;  %710 = vmatpush.msrb.mxu1 %v1179_v34 }
 0x19d   :  { %691 = vmatpush.msrb.mxu0 %v1169_v31  ;;  %711 = vmatpush.msrb.mxu1 %v1187_v36 }
 0x19e   :  { %v1425_v44 = vpop.f32.mrf.mxu0 }
 0x19f   :  { %692 = vmatpush.msrb.mxu0 %v1177_v33  ;;  %712 = vmatpush.msrb.mxu1 %v1194_v37 }
 0x1a6   :  { %v1429_v46 = vpop.f32.mrf.mxu0 }
 0x1fd   :  { %v418_v50 = vpop.f32.mrf.mxu0  ;;  %v438_v56 = vpop.f32.mrf.mxu1 }
 0x1fe   :  { %v441_v51 = vadd.f32 %v418_v50, %v155_v49  ;;  %v442_v60 = vadd.f32 %v438_v56, %v196_v57 }
 0x200   :  { %v853_v52 = vmul.f32 -1.442695, %v441_v51  ;;  %v462_v9 = vmax.f32 %v442_v60, 0.0 }
 0x202   :  { %876 = vpow2.f32 %v853_v52  ;;  %v463_v50 = vsub.f32 %v462_v9, %v1378_v17 }
 0x208   :  { %v877_v54 = vpop.eup %876 }
 0x209   :  { %v446_v55 = vadd.f32 1.0, %v877_v54 }
 0x20b   :  { %878 = vrcp.f32 %v446_v55  ;;  %v458_v62 = vand.u32 2147483648, %v446_v55  ;;  %v456_v8 = vand.u32 2147483647, %v446_v55  ;;  %vm452_vm10 = vweird.f32 %v446_v55 }
 0x20d   :  { %v459_v18 = vor.u32 1.1754944e-38, %v458_v62  ;;  %vm457_vm12 = vcmp.eq.f32.partialorder %v456_v8, 8.507059e+37 }
 0x211   :  { %v879_v58 = vpop.eup %878 }
 0x212   :  { %v448_v59 = vmul.f32 %v879_v58, %v446_v55  ;;  %vm453_vm9 = vweird.f32 %v879_v58 }
 0x213   :  { %vm454_vm11 = vmor %vm452_vm10, %vm453_vm9 }
 0x214   :  { %v449_v61 = vsub.f32 1.0, %v448_v59 }
 0x216   :  { %v450_v63 = vmul.f32 %v879_v58, %v449_v61 }
 0x218   :  { %v451_v12 = vadd.f32 %v879_v58, %v450_v63 }
 0x21a   :  { %v455_v49 = vsel %vm454_vm11, %v879_v58, %v451_v12 }
 0x21b   :  { %v460_v51 = vsel %vm457_vm12, %v459_v18, %v455_v49 }
 0x21c   :  { %v464_v52 = vmul.f32 %v463_v50, %v460_v51  ;;  %v205_v51 = vadd.f32 %v1427_v45, %v1320_v48  ;;  %v167_v45 = vadd.f32 %v1425_v44, %v1315_v39 }
 0x21e   :  { %v1439_v38 = vadd.f32 %v464_v52, %v1378_v17 }
 0x220   :  { %467 = vst [vmem:[#allocation12 + $0x10] sm:$0xff] %v1439_v38  ;;  %486 = vmatmul.f32.vlgmr.msra.gmra.mxu2 %v1439_v38  ;;  %506 = vmatmul.f32.vlgmr.msra.gmra.mxu3 %v1439_v38 }
 0x221   :  { %746 = vmatpush.msra.mxu2 %v1082_v0  ;;  %766 = vmatpush.msra.mxu3 %v1092_v4  ;;  %v158_v0 = vadd.f32 %v1415_v35, %v1315_v39 }
 0x223   :  { %747 = vmatpush.msra.mxu2 %v1084_v1  ;;  %767 = vmatpush.msra.mxu3 %v1096_v5 }
 0x225   :  { %748 = vmatpush.msra.mxu2 %v1087_v2  ;;  %768 = vmatpush.msra.mxu3 %v1100_v7  ;;  %v199_v7 = vadd.f32 %v1419_v41, %v1320_v48 }
 0x227   :  { %749 = vmatpush.msra.mxu2 %v1090_v3  ;;  %769 = vmatpush.msra.mxu3 %v1106_v11 }
 0x229   :  { %750 = vmatpush.msra.mxu2 %v1098_v6  ;;  %770 = vmatpush.msra.mxu3 %v1112_v14 }
 0x22b   :  { %751 = vmatpush.msra.mxu2 %v1104_v10  ;;  %771 = vmatpush.msra.mxu3 %v1118_v16 }
 0x22d   :  { %752 = vmatpush.msra.mxu2 %v1110_v13  ;;  %772 = vmatpush.msra.mxu3 %v1125_v20 }
 0x22f   :  { %753 = vmatpush.msra.mxu2 %v1116_v15  ;;  %773 = vmatpush.msra.mxu3 %v1132_v22 }
 0x231   :  { %754 = vmatpush.msra.mxu2 %v1123_v19  ;;  %774 = vmatpush.msra.mxu3 %v1139_v24 }
 0x233   :  { %755 = vmatpush.msra.mxu2 %v1130_v21  ;;  %775 = vmatpush.msra.mxu3 %v1147_v26 }
 0x235   :  { %756 = vmatpush.msra.mxu2 %v1137_v23  ;;  %776 = vmatpush.msra.mxu3 %v1155_v28  ;;  %v161_v28 = vadd.f32 %v1417_v40, %v1315_v39 }
 0x237   :  { %757 = vmatpush.msra.mxu2 %v1145_v25  ;;  %777 = vmatpush.msra.mxu3 %v1163_v30 }
 0x239   :  { %758 = vmatpush.msra.mxu2 %v1153_v27  ;;  %778 = vmatpush.msra.mxu3 %v1171_v32 }
 0x23b   :  { %759 = vmatpush.msra.mxu2 %v1161_v29  ;;  %779 = vmatpush.msra.mxu3 %v1179_v34 }
 0x23d   :  { %760 = vmatpush.msra.mxu2 %v1169_v31  ;;  %780 = vmatpush.msra.mxu3 %v1187_v36  ;;  %v202_v36 = vadd.f32 %v1423_v43, %v1320_v48  ;;  %v164_v43 = vadd.f32 %v1421_v42, %v1315_v39 }
 0x23f   :  { %761 = vmatpush.msra.mxu2 %v1177_v33  ;;  %781 = vmatpush.msra.mxu3 %v1194_v37 }
 0x2a3   :  { %v487_v1 = vpop.f32.mrf.mxu2  ;;  %v507_v6 = vpop.f32.mrf.mxu3 }
 0x2a4   :  { %v510_v2 = vadd.f32 %v487_v1, %v158_v0  ;;  %v511_v13 = vadd.f32 %v507_v6, %v199_v7 }
 0x2a6   :  { %v854_v3 = vmul.f32 -1.442695, %v510_v2  ;;  %v531_v20 = vmax.f32 %v511_v13, 0.0 }
 0x2a8   :  { %880 = vpow2.f32 %v854_v3  ;;  %v532_v24 = vsub.f32 %v531_v20, %v1439_v38 }
 0x2ae   :  { %v881_v4 = vpop.eup %880 }
 0x2af   :  { %v515_v5 = vadd.f32 1.0, %v881_v4 }
 0x2b1   :  { %882 = vrcp.f32 %v515_v5  ;;  %v527_v15 = vand.u32 2147483648, %v515_v5  ;;  %v525_v19 = vand.u32 2147483647, %v515_v5  ;;  %vm521_vm14 = vweird.f32 %v515_v5 }
 0x2b3   :  { %v528_v22 = vor.u32 1.1754944e-38, %v527_v15  ;;  %vm526_vm0 = vcmp.eq.f32.partialorder %v525_v19, 8.507059e+37 }
 0x2b7   :  { %v883_v10 = vpop.eup %882 }
 0x2b8   :  { %v517_v11 = vmul.f32 %v883_v10, %v515_v5  ;;  %vm522_vm13 = vweird.f32 %v883_v10 }
 0x2b9   :  { %vm523_vm15 = vmor %vm521_vm14, %vm522_vm13 }
 0x2ba   :  { %v518_v14 = vsub.f32 1.0, %v517_v11 }
 0x2bc   :  { %v519_v16 = vmul.f32 %v883_v10, %v518_v14 }
 0x2be   :  { %v520_v21 = vadd.f32 %v883_v10, %v519_v16 }
 0x2c0   :  { %v524_v23 = vsel %vm523_vm15, %v883_v10, %v520_v21 }
 0x2c1   :  { %v529_v25 = vsel %vm526_vm0, %v528_v22, %v524_v23  ;;  %v208_v23 = vadd.f32 %v1431_v47, %v1320_v48  ;;  %v170_v47 = vadd.f32 %v1429_v46, %v1315_v39 }
 0x2c2   :  { %v533_v26 = vmul.f32 %v532_v24, %v529_v25 }
 0x2c4   :  { %v534_v27 = vadd.f32 %v533_v26, %v1439_v38 }
 0x2c6   :  { %536 = vst [vmem:[#allocation12 + $0x18] sm:$0xff] %v534_v27  ;;  %555 = vmatmul.f32.vlgmr.msra.gmra.mxu0 %v534_v27  ;;  %575 = vmatmul.f32.vlgmr.msra.gmra.mxu1 %v534_v27 }
 0x343   :  { %v556_v29 = vpop.f32.mrf.mxu0  ;;  %v576_v34 = vpop.f32.mrf.mxu1 }
 0x344   :  { %v579_v30 = vadd.f32 %v556_v29, %v161_v28  ;;  %v580_v35 = vadd.f32 %v576_v34, %v202_v36 }
 0x346   :  { %v855_v31 = vmul.f32 -1.442695, %v579_v30  ;;  %v600_v40 = vmax.f32 %v580_v35, 0.0 }
 0x348   :  { %884 = vpow2.f32 %v855_v31  ;;  %v601_v60 = vsub.f32 %v600_v40, %v534_v27 }
 0x34e   :  { %v885_v32 = vpop.eup %884 }
 0x34f   :  { %v584_v33 = vadd.f32 1.0, %v885_v32 }
 0x351   :  { %886 = vrcp.f32 %v584_v33  ;;  %v596_v54 = vand.u32 2147483648, %v584_v33  ;;  %v594_v56 = vand.u32 2147483647, %v584_v33  ;;  %vm590_vm2 = vweird.f32 %v584_v33 }
 0x353   :  { %v597_v58 = vor.u32 1.1754944e-38, %v596_v54  ;;  %vm595_vm4 = vcmp.eq.f32.partialorder %v594_v56, 8.507059e+37 }
 0x357   :  { %v887_v37 = vpop.eup %886 }
 0x358   :  { %v586_v17 = vmul.f32 %v887_v37, %v584_v33  ;;  %vm591_vm1 = vweird.f32 %v887_v37 }
 0x359   :  { %vm592_vm3 = vmor %vm590_vm2, %vm591_vm1 }
 0x35a   :  { %v587_v41 = vsub.f32 1.0, %v586_v17 }
 0x35c   :  { %v588_v55 = vmul.f32 %v887_v37, %v587_v41 }
 0x35e   :  { %v589_v57 = vadd.f32 %v887_v37, %v588_v55 }
 0x360   :  { %v593_v59 = vsel %vm592_vm3, %v887_v37, %v589_v57  ;;  %v211_v57 = vadd.f32 %v1434_v53, %v1320_v48 }
 0x361   :  { %v598_v61 = vsel %vm595_vm4, %v597_v58, %v593_v59 }
 0x362   :  { %v602_v62 = vmul.f32 %v601_v60, %v598_v61 }
 0x364   :  { %v603_v63 = vadd.f32 %v602_v62, %v534_v27 }
 0x366   :  { %605 = vst [vmem:[#allocation12 + $0x20] sm:$0xff] %v603_v63  ;;  %624 = vmatmul.f32.vlgmr.msrb.gmra.mxu2 %v603_v63  ;;  %644 = vmatmul.f32.vlgmr.msrb.gmra.mxu3 %v603_v63 }
 0x3e9   :  { %v625_v8 = vpop.f32.mrf.mxu2  ;;  %v645_v50 = vpop.f32.mrf.mxu3 }
 0x3ea   :  { %v648_v9 = vadd.f32 %v625_v8, %v164_v43  ;;  %v649_v0 = vadd.f32 %v645_v50, %v205_v51 }
 0x3ec   :  { %v856_v12 = vmul.f32 -1.442695, %v648_v9  ;;  %v669_v42 = vmax.f32 %v649_v0, 0.0 }
 0x3ee   :  { %888 = vpow2.f32 %v856_v12  ;;  %v670_v10 = vsub.f32 %v669_v42, %v603_v63 }
 0x3f4   :  { %v889_v18 = vpop.eup %888 }
 0x3f5   :  { %v653_v49 = vadd.f32 1.0, %v889_v18 }
 0x3f7   :  { %890 = vrcp.f32 %v653_v49  ;;  %v665_v2 = vand.u32 2147483648, %v653_v49  ;;  %v663_v4 = vand.u32 2147483647, %v653_v49  ;;  %vm659_vm6 = vweird.f32 %v653_v49 }
 0x3f9   :  { %v666_v6 = vor.u32 1.1754944e-38, %v665_v2  ;;  %vm664_vm8 = vcmp.eq.f32.partialorder %v663_v4, 8.507059e+37 }
 0x3fd   :  { %v891_v52 = vpop.eup %890 }
 0x3fe   :  { %v655_v38 = vmul.f32 %v891_v52, %v653_v49  ;;  %vm660_vm5 = vweird.f32 %v891_v52 }
 0x3ff   :  { %vm661_vm7 = vmor %vm659_vm6, %vm660_vm5 }
 0x400   :  { %v656_v1 = vsub.f32 1.0, %v655_v38 }
 0x402   :  { %v657_v3 = vmul.f32 %v891_v52, %v656_v1 }
 0x404   :  { %v658_v5 = vadd.f32 %v891_v52, %v657_v3 }
 0x406   :  { %v662_v7 = vsel %vm661_vm7, %v891_v52, %v658_v5 }
 0x407   :  { %v667_v11 = vsel %vm664_vm8, %v666_v6, %v662_v7 }
 0x408   :  { %v671_v13 = vmul.f32 %v670_v10, %v667_v11 }
 0x40a   :  { %v672_v14 = vadd.f32 %v671_v13, %v603_v63 }
 0x40c   :  { %674 = vst [vmem:[#allocation12 + $0x28] sm:$0xff] %v672_v14  ;;  %693 = vmatmul.f32.vlgmr.msrb.gmra.mxu0 %v672_v14  ;;  %713 = vmatmul.f32.vlgmr.msrb.gmra.mxu1 %v672_v14 }
 0x489   :  { %v694_v15 = vpop.f32.mrf.mxu0  ;;  %v714_v22 = vpop.f32.mrf.mxu1 }
 0x48a   :  { %v717_v16 = vadd.f32 %v694_v15, %v167_v45  ;;  %v718_v26 = vadd.f32 %v714_v22, %v208_v23 }
 0x48c   :  { %v857_v19 = vmul.f32 -1.442695, %v717_v16  ;;  %v738_v44 = vmax.f32 %v718_v26, 0.0 }
 0x48e   :  { %892 = vpow2.f32 %v857_v19  ;;  %v739_v34 = vsub.f32 %v738_v44, %v672_v14 }
 0x494   :  { %v893_v20 = vpop.eup %892 }
 0x495   :  { %v722_v21 = vadd.f32 1.0, %v893_v20 }
 0x497   :  { %894 = vrcp.f32 %v722_v21  ;;  %v734_v28 = vand.u32 2147483648, %v722_v21  ;;  %v732_v30 = vand.u32 2147483647, %v722_v21  ;;  %vm728_vm10 = vweird.f32 %v722_v21 }
 0x499   :  { %v735_v32 = vor.u32 1.1754944e-38, %v734_v28  ;;  %vm733_vm12 = vcmp.eq.f32.partialorder %v732_v30, 8.507059e+37 }
 0x49d   :  { %v895_v24 = vpop.eup %894 }
 0x49e   :  { %v724_v25 = vmul.f32 %v895_v24, %v722_v21  ;;  %vm729_vm9 = vweird.f32 %v895_v24 }
 0x49f   :  { %vm730_vm11 = vmor %vm728_vm10, %vm729_vm9 }
 0x4a0   :  { %v725_v27 = vsub.f32 1.0, %v724_v25 }
 0x4a2   :  { %v726_v29 = vmul.f32 %v895_v24, %v725_v27 }
 0x4a4   :  { %v727_v31 = vadd.f32 %v895_v24, %v726_v29 }
 0x4a6   :  { %v731_v33 = vsel %vm730_vm11, %v895_v24, %v727_v31 }
 0x4a7   :  { %v736_v36 = vsel %vm733_vm12, %v735_v32, %v731_v33 }
 0x4a8   :  { %v740_v37 = vmul.f32 %v739_v34, %v736_v36 }
 0x4aa   :  { %v741_v17 = vadd.f32 %v740_v37, %v672_v14 }
 0x4ac   :  { %743 = vst [vmem:[#allocation12 + $0x30] sm:$0xff] %v741_v17  ;;  %762 = vmatmul.f32.vlgmr.msra.gmra.mxu2 %v741_v17  ;;  %782 = vmatmul.f32.vlgmr.msra.gmra.mxu3 %v741_v17 }
 0x52f   :  { %v763_v35 = vpop.f32.mrf.mxu2  ;;  %v783_v40 = vpop.f32.mrf.mxu3 }
 0x530   :  { %v786_v41 = vadd.f32 %v763_v35, %v170_v47  ;;  %v787_v60 = vadd.f32 %v783_v40, %v211_v57 }
 0x532   :  { %v858_v54 = vmul.f32 -1.442695, %v786_v41  ;;  %v807_v39 = vmax.f32 %v787_v60, 0.0 }
 0x534   :  { %896 = vpow2.f32 %v858_v54  ;;  %v808_v12 = vsub.f32 %v807_v39, %v741_v17 }
 0x53a   :  { %v897_v55 = vpop.eup %896 }
 0x53b   :  { %v791_v56 = vadd.f32 1.0, %v897_v55 }
 0x53d   :  { %898 = vrcp.f32 %v791_v56  ;;  %v803_v62 = vand.u32 2147483648, %v791_v56  ;;  %v801_v43 = vand.u32 2147483647, %v791_v56  ;;  %vm797_vm14 = vweird.f32 %v791_v56 }
 0x53f   :  { %v804_v8 = vor.u32 1.1754944e-38, %v803_v62  ;;  %vm802_vm0 = vcmp.eq.f32.partialorder %v801_v43, 8.507059e+37 }
 0x543   :  { %v899_v58 = vpop.eup %898 }
 0x544   :  { %v793_v59 = vmul.f32 %v899_v58, %v791_v56  ;;  %vm798_vm13 = vweird.f32 %v899_v58 }
 0x545   :  { %vm799_vm15 = vmor %vm797_vm14, %vm798_vm13 }
 0x546   :  { %v794_v61 = vsub.f32 1.0, %v793_v59 }
 0x548   :  { %v795_v63 = vmul.f32 %v899_v58, %v794_v61 }
 0x54a   :  { %v796_v46 = vadd.f32 %v899_v58, %v795_v63 }
 0x54c   :  { %v800_v9 = vsel %vm799_vm15, %v899_v58, %v796_v46 }
 0x54d   :  { %v805_v18 = vsel %vm802_vm0, %v804_v8, %v800_v9 }
 0x54e   :  { %v809_v48 = vmul.f32 %v808_v12, %v805_v18 }
 0x550   :  { %v810_v53 = vadd.f32 %v809_v48, %v741_v17 }
 0x552   :  { %812 = vst [vmem:[#allocation12 + $0x38] sm:$0xff] %v810_v53 }
 0x553   :  { %826 = dma.vmem_to_hbm [thread:$0]  %s819_s15, 1024, %s821_s18, [#allocation6], %s1030_s28, %s1030_s28, %s1031_s29  }
 0x554   :  { %1026 = dma.done.wait [#allocation6], 1024  }
 0x555   :  { %1027 = vsyncadd [#allocation6], 4294966272 }
 0x556   :  { %831 = vsyncpa [#allocation5], 1 }
 0x557   :  { %832 = vsyncpa [#allocation8], 1 }
 0x558   :  { %833 = vsyncpa [#allocation11], 1 }
 0x559   :  { %834 = vsyncpa [#allocation6], 1 }

</bundles_post_ra>
